<compile_context>
chip_gen: v7x
topology: tpu7x:2x2x1
jax: 0.10.0
libtpu: 0.0.40
codegen_flags: <defaults>
</compile_context>

<pallas_src>
import functools

import jax
import jax.numpy as jnp
from jax import lax
from jax.experimental import pallas as pl
from jax.experimental.pallas import tpu as pltpu

# Scoped VMEM budget: above v5e/v6e defaults, with headroom under v7x's 64 MiB.
VMEM_LIMIT = 48 * 1024 * 1024


def _gelu_tanh(x):
    # TODO(synk): PyTorch nn.GELU() default is the exact erf-based GELU; the tanh
    # approximation (max abs deviation ~1e-3) is used since erf lowering in Mosaic
    # is not guaranteed.
    c = 0.7978845608028654  # sqrt(2/pi)
    return 0.5 * x * (1.0 + jnp.tanh(c * (x + 0.044715 * x * x * x)))


def _layernorm(v, w2d, b2d, eps=1e-5):
    mu = jnp.mean(v, axis=-1, keepdims=True)
    var = jnp.mean((v - mu) ** 2, axis=-1, keepdims=True)
    return (v - mu) * lax.rsqrt(var + eps) * w2d + b2d


def _const_spec(shape):
    nd = len(shape)
    return pl.BlockSpec(shape, lambda *args, _nd=nd: (0,) * _nd)


def _pick_chunk(n, target=512):
    """Largest KV chunk <= target that divides n and is a multiple of 8."""
    if n <= target:
        return n
    t = (target // 8) * 8
    while t >= 8:
        if n % t == 0:
            return t
        t -= 8
    return n


# ----------------------- fused per-layer kernel -----------------------
def layer_kernel(x_ref, ln1w_ref, ln1b_ref, wqkv_ref, wo_ref, bo_ref,
                 ln2w_ref, ln2b_ref, w1_ref, b1_ref, w2_ref, b2_ref,
                 out_ref, *, heads, dim_head, kv_chunk, scale):
    inner = heads * dim_head
    x = x_ref[0]                                   # (N, D) f32
    n = x.shape[0]

    # ---- LN1 + fused QKV projection: one wide MXU matmul ----
    y1 = _layernorm(x, ln1w_ref[...], ln1b_ref[...]).astype(jnp.bfloat16)
    qkv = jnp.dot(y1, wqkv_ref[...],
                  preferred_element_type=jnp.float32)          # (N, 3*inner) f32
    q_f = qkv[:, :inner] * scale                               # scale in f32
    k_f = qkv[:, inner:2 * inner]
    v_f = qkv[:, 2 * inner:]

    # ---- attention: per-head flash-style online softmax over KV chunks ----
    # Only (N, kv_chunk) f32 scores are live at any time; all per-head work is on
    # static lane slices of values (no masked per-head stores to refs).
    num_chunks = n // kv_chunk
    o_heads = []
    for h in range(heads):
        hs, he = h * dim_head, (h + 1) * dim_head
        q_h = q_f[:, hs:he].astype(jnp.bfloat16)               # (N, dh)
        m_h = jnp.full((n, 1), -jnp.inf, jnp.float32)
        l_h = jnp.zeros((n, 1), jnp.float32)
        acc = jnp.zeros((n, dim_head), jnp.float32)
        for c in range(num_chunks):
            cs = c * kv_chunk
            k_c = k_f[cs:cs + kv_chunk, hs:he].astype(jnp.bfloat16)
            v_c = v_f[cs:cs + kv_chunk, hs:he].astype(jnp.bfloat16)
            # q @ k^T via dot_general contracting the last dims (no transpose).
            s = lax.dot_general(q_h, k_c, (((1,), (1,)), ((), ())),
                                preferred_element_type=jnp.float32)   # (N, TK)
            m_new = jnp.maximum(m_h, jnp.max(s, axis=-1, keepdims=True))
            alpha = jnp.exp(m_h - m_new)
            p = jnp.exp(s - m_new)
            l_h = alpha * l_h + jnp.sum(p, axis=-1, keepdims=True)
            acc = alpha * acc + jnp.dot(p.astype(jnp.bfloat16), v_c,
                                        preferred_element_type=jnp.float32)
            m_h = m_new
        inv_l = pl.reciprocal(l_h, approx=True)                # divide on the EUP
        o_heads.append(acc * inv_l)

    # Merge heads into a lane-dense (N, H*dh) slab (single concat, no store loop),
    # feeding one wide out-projection matmul.
    o = jnp.concatenate(o_heads, axis=1).astype(jnp.bfloat16)  # (N, inner)

    # ---- out-projection + residual ----
    attn = jnp.dot(o, wo_ref[...],
                   preferred_element_type=jnp.float32) + bo_ref[...]
    x1 = x + attn                                              # (N, D) f32

    # ---- LN2 + MLP + residual (fused into the same kernel) ----
    y2 = _layernorm(x1, ln2w_ref[...], ln2b_ref[...]).astype(jnp.bfloat16)
    h1 = jnp.dot(y2, w1_ref[...], preferred_element_type=jnp.float32) + b1_ref[...]
    h1 = _gelu_tanh(h1).astype(jnp.bfloat16)                   # GELU in f32
    h2 = jnp.dot(h1, w2_ref[...], preferred_element_type=jnp.float32) + b2_ref[...]
    out_ref[0] = (x1 + h2).astype(out_ref.dtype)


# ------------------------------- one layer -------------------------------
def run_layer(x, params, *, heads, dim_head):
    (ln1w, ln1b, wqkv, wo, bo, ln2w, ln2b, w1, b1, w2, b2) = params
    B, N, D = x.shape
    kv_chunk = _pick_chunk(N)          # caps the live f32 score tile per head
    scale = dim_head ** -0.5

    # TODO(synk): D=32 (< 128 lanes) makes the output stores lane-sparse; real ViT
    # dims (multiples of 128) avoid this — model dims are fixed by the spec here.

    kernel = functools.partial(layer_kernel, heads=heads, dim_head=dim_head,
                               kv_chunk=kv_chunk, scale=scale)
    return pl.pallas_call(
        kernel,
        out_shape=jax.ShapeDtypeStruct((B, N, D), x.dtype),
        grid=(B,),
        in_specs=[
            pl.BlockSpec((1, N, D), lambda b: (b, 0, 0)),
            _const_spec(ln1w.shape), _const_spec(ln1b.shape),
            _const_spec(wqkv.shape),
            _const_spec(wo.shape), _const_spec(bo.shape),
            _const_spec(ln2w.shape), _const_spec(ln2b.shape),
            _const_spec(w1.shape), _const_spec(b1.shape),
            _const_spec(w2.shape), _const_spec(b2.shape),
        ],
        out_specs=pl.BlockSpec((1, N, D), lambda b: (b, 0, 0)),
        input_output_aliases={0: 0},            # residual input aliased to output
        compiler_params=pltpu.CompilerParams(
            dimension_semantics=("parallel",),
            vmem_limit_bytes=VMEM_LIMIT),
    )(x, ln1w, ln1b, wqkv, wo, bo, ln2w, ln2b, w1, b1, w2, b2)


@functools.partial(jax.jit, static_argnames=("heads", "dim_head"))
def transformer_block_pallas(x, layers, *, heads, dim_head):
    for params in layers:
        x = run_layer(x, params, heads=heads, dim_head=dim_head)
    return x


# ----------------------- deterministic parameter init -----------------------
def init_reference_params(key, depth, dim, heads, dim_head, mlp_dim):
    """f32 parameters (PyTorch-like layout) used by the pure-JAX reference."""
    inner = heads * dim_head
    layers = []
    for _ in range(depth):
        key, k0, k1, k2, k3, k4 = jax.random.split(key, 6)
        ln1w = jnp.ones((dim,), jnp.float32)
        ln1b = jnp.zeros((dim,), jnp.float32)
        wqkv = 0.05 * jax.random.normal(k0, (dim, 3 * inner), jnp.float32)
        wo = 0.05 * jax.random.normal(k1, (inner, dim), jnp.float32)
        bo = 0.05 * jax.random.normal(k2, (dim,), jnp.float32)
        ln2w = jnp.ones((dim,), jnp.float32)
        ln2b = jnp.zeros((dim,), jnp.float32)
        w1 = 0.05 * jax.random.normal(k3, (dim, mlp_dim), jnp.float32)
        b1 = jnp.zeros((mlp_dim,), jnp.float32)
        w2 = 0.05 * jax.random.normal(k4, (mlp_dim, dim), jnp.float32)
        b2 = jnp.zeros((dim,), jnp.float32)
        layers.append((ln1w, ln1b, wqkv, wo, bo, ln2w, ln2b, w1, b1, w2, b2))
    return layers


def prepare_kernel_params(ref_layers):
    """Kernel layout: fused QKV weight kept whole, bf16 matmul weights, 2-D LN/bias."""
    out = []
    for (ln1w, ln1b, wqkv, wo, bo, ln2w, ln2b, w1, b1, w2, b2) in ref_layers:
        out.append((
            ln1w.reshape(1, -1), ln1b.reshape(1, -1),
            wqkv.astype(jnp.bfloat16),
            wo.astype(jnp.bfloat16), bo.reshape(1, -1),
            ln2w.reshape(1, -1), ln2b.reshape(1, -1),
            w1.astype(jnp.bfloat16), b1.reshape(1, -1),
            w2.astype(jnp.bfloat16), b2.reshape(1, -1),
        ))
    return out


# ----------------------- pure-JAX reference (for checking) -----------------------
def reference(x, layers, heads, dim_head):
    inner = heads * dim_head

    def ln(v, w, b):
        mu = v.mean(-1, keepdims=True)
        var = ((v - mu) ** 2).mean(-1, keepdims=True)
        return (v - mu) / jnp.sqrt(var + 1e-5) * w + b

    for (ln1w, ln1b, wqkv, wo, bo, ln2w, ln2b, w1, b1, w2, b2) in layers:
        B, N, _ = x.shape
        y = ln(x, ln1w, ln1b)
        qkv = y @ wqkv
        q, k, v = jnp.split(qkv, 3, axis=-1)
        sp = lambda t: t.reshape(B, N, heads, dim_head).transpose(0, 2, 1, 3)
        q, k, v = sp(q), sp(k), sp(v)
        s = jnp.einsum('bhnd,bhmd->bhnm', q, k) * dim_head ** -0.5
        p = jax.nn.softmax(s, axis=-1)
        o = jnp.einsum('bhnm,bhmd->bhnd', p, v)
        o = o.transpose(0, 2, 1, 3).reshape(B, N, inner)
        x = x + (o @ wo + bo)
        y = ln(x, ln2w, ln2b)
        x = x + (_gelu_tanh(y @ w1 + b1) @ w2 + b2)
    return x


if __name__ == "__main__":
    B, N, dim = 2, 8, 32
    depth, heads, dim_head, mlp_dim = 2, 4, 8, 64

    key = jax.random.PRNGKey(0)
    kx, kp = jax.random.split(key)
    x = jax.random.normal(kx, (B, N, dim), dtype=jnp.float32)
    ref_layers = init_reference_params(kp, depth, dim, heads, dim_head, mlp_dim)
    kern_layers = prepare_kernel_params(ref_layers)

    ref = jax.block_until_ready(reference(x, ref_layers, heads, dim_head))

    out = transformer_block_pallas(x, kern_layers, heads=heads, dim_head=dim_head)
    out = jax.block_until_ready(out)

    assert out.shape == (B, N, dim)
    max_err = float(jnp.max(jnp.abs(out - ref)))
    assert jnp.allclose(out, ref, atol=3e-2, rtol=3e-2), max_err

    print("KERNEL_OK")
</pallas_src>

<mosaic_0001>
module attributes {stable_mosaic.version = 11 : i64} {
  func.func @layer_kernel(%arg0: i32, %arg1: memref<1x8x32xf32, #tpu.memory_space<vmem>>, %arg2: memref<1x32xf32, #tpu.memory_space<vmem>>, %arg3: memref<1x32xf32, #tpu.memory_space<vmem>>, %arg4: memref<32x96xbf16, #tpu.memory_space<vmem>>, %arg5: memref<32x32xbf16, #tpu.memory_space<vmem>>, %arg6: memref<1x32xf32, #tpu.memory_space<vmem>>, %arg7: memref<1x32xf32, #tpu.memory_space<vmem>>, %arg8: memref<1x32xf32, #tpu.memory_space<vmem>>, %arg9: memref<32x64xbf16, #tpu.memory_space<vmem>>, %arg10: memref<1x64xf32, #tpu.memory_space<vmem>>, %arg11: memref<64x32xbf16, #tpu.memory_space<vmem>>, %arg12: memref<1x32xf32, #tpu.memory_space<vmem>>, %arg13: memref<1x8x32xf32, #tpu.memory_space<vmem>>) attributes {dimension_semantics = [#tpu.dimension_semantics<parallel>], iteration_bounds = array<i64: 2>, scalar_prefetch = 0 : i64, scratch_operands = 0 : i64, tpu.core_type = #tpu.core_type<tc>, window_params = [{transform_indices = @transform_0, window_bounds = array<i64: 1, 8, 32>}, {pipeline_mode = #tpu.pipeline_mode<synchronous>, transform_indices = @transform_1, window_bounds = array<i64: 1, 32>}, {pipeline_mode = #tpu.pipeline_mode<synchronous>, transform_indices = @transform_2, window_bounds = array<i64: 1, 32>}, {pipeline_mode = #tpu.pipeline_mode<synchronous>, transform_indices = @transform_3, window_bounds = array<i64: 32, 96>}, {pipeline_mode = #tpu.pipeline_mode<synchronous>, transform_indices = @transform_4, window_bounds = array<i64: 32, 32>}, {pipeline_mode = #tpu.pipeline_mode<synchronous>, transform_indices = @transform_5, window_bounds = array<i64: 1, 32>}, {pipeline_mode = #tpu.pipeline_mode<synchronous>, transform_indices = @transform_6, window_bounds = array<i64: 1, 32>}, {pipeline_mode = #tpu.pipeline_mode<synchronous>, transform_indices = @transform_7, window_bounds = array<i64: 1, 32>}, {pipeline_mode = #tpu.pipeline_mode<synchronous>, transform_indices = @transform_8, window_bounds = array<i64: 32, 64>}, {pipeline_mode = #tpu.pipeline_mode<synchronous>, transform_indices = @transform_9, window_bounds = array<i64: 1, 64>}, {pipeline_mode = #tpu.pipeline_mode<synchronous>, transform_indices = @transform_10, window_bounds = array<i64: 64, 32>}, {pipeline_mode = #tpu.pipeline_mode<synchronous>, transform_indices = @transform_11, window_bounds = array<i64: 1, 32>}, {transform_indices = @transform_12, window_bounds = array<i64: 1, 8, 32>}]} {
    %c0 = arith.constant 0 : index
    %c0_0 = arith.constant 0 : index
    %c0_1 = arith.constant 0 : index
    %0 = vector.load %arg1[%c0, %c0_0, %c0_1] : memref<1x8x32xf32, #tpu.memory_space<vmem>>, vector<1x8x32xf32>
    %1 = vector.shape_cast %0 : vector<1x8x32xf32> to vector<8x32xf32>
    %c0_2 = arith.constant 0 : index
    %c0_3 = arith.constant 0 : index
    %2 = vector.load %arg2[%c0_2, %c0_3] : memref<1x32xf32, #tpu.memory_space<vmem>>, vector<1x32xf32>
    %c0_4 = arith.constant 0 : index
    %c0_5 = arith.constant 0 : index
    %3 = vector.load %arg3[%c0_4, %c0_5] : memref<1x32xf32, #tpu.memory_space<vmem>>, vector<1x32xf32>
    %cst = arith.constant dense<0.000000e+00> : vector<8xf32>
    %4 = vector.multi_reduction <add>, %1, %cst [1] : vector<8x32xf32> to vector<8xf32>
    %5 = vector.shape_cast %4 : vector<8xf32> to vector<8x1xf32>
    %cst_6 = arith.constant 3.200000e+01 : f32
    %6 = vector.broadcast %cst_6 : f32 to vector<8x1xf32>
    %7 = arith.divf %5, %6 : vector<8x1xf32>
    %8 = vector.broadcast %7 : vector<8x1xf32> to vector<8x32xf32>
    %9 = arith.subf %1, %8 : vector<8x32xf32>
    %10 = arith.mulf %9, %9 : vector<8x32xf32>
    %cst_7 = arith.constant dense<0.000000e+00> : vector<8xf32>
    %11 = vector.multi_reduction <add>, %10, %cst_7 [1] : vector<8x32xf32> to vector<8xf32>
    %12 = vector.shape_cast %11 : vector<8xf32> to vector<8x1xf32>
    %cst_8 = arith.constant 3.200000e+01 : f32
    %13 = vector.broadcast %cst_8 : f32 to vector<8x1xf32>
    %14 = arith.divf %12, %13 : vector<8x1xf32>
    %15 = vector.broadcast %7 : vector<8x1xf32> to vector<8x32xf32>
    %16 = arith.subf %1, %15 : vector<8x32xf32>
    %cst_9 = arith.constant 9.99999974E-6 : f32
    %17 = vector.broadcast %cst_9 : f32 to vector<8x1xf32>
    %18 = arith.addf %14, %17 : vector<8x1xf32>
    %19 = math.rsqrt %18 : vector<8x1xf32>
    %20 = vector.broadcast %19 : vector<8x1xf32> to vector<8x32xf32>
    %21 = arith.mulf %16, %20 : vector<8x32xf32>
    %22 = vector.broadcast %2 : vector<1x32xf32> to vector<8x32xf32>
    %23 = arith.mulf %21, %22 : vector<8x32xf32>
    %24 = vector.broadcast %3 : vector<1x32xf32> to vector<8x32xf32>
    %25 = arith.addf %23, %24 : vector<8x32xf32>
    %26 = arith.truncf %25 : vector<8x32xf32> to vector<8x32xbf16>
    %c0_10 = arith.constant 0 : index
    %c0_11 = arith.constant 0 : index
    %27 = vector.load %arg4[%c0_10, %c0_11] : memref<32x96xbf16, #tpu.memory_space<vmem>>, vector<32x96xbf16>
    %cst_12 = arith.constant dense<0.000000e+00> : vector<8x96xf32>
    %28 = tpu.matmul %26, %27, %cst_12 {dimension_numbers = #tpu.dot_dimension_numbers<[1], [0], [0], [1], [0, 0, 1, 1], [], []>} : vector<8x32xbf16>, vector<32x96xbf16>, vector<8x96xf32> -> vector<8x96xf32>
    %29 = vector.extract_strided_slice %28 {offsets = [0, 0], sizes = [8, 32], strides = [1, 1]} : vector<8x96xf32> to vector<8x32xf32>
    %cst_13 = arith.constant 0.353553385 : f32
    %30 = vector.broadcast %cst_13 : f32 to vector<8x32xf32>
    %31 = arith.mulf %29, %30 : vector<8x32xf32>
    %32 = vector.extract_strided_slice %28 {offsets = [0, 32], sizes = [8, 32], strides = [1, 1]} : vector<8x96xf32> to vector<8x32xf32>
    %33 = vector.extract_strided_slice %28 {offsets = [0, 64], sizes = [8, 32], strides = [1, 1]} : vector<8x96xf32> to vector<8x32xf32>
    %34 = vector.extract_strided_slice %31 {offsets = [0, 0], sizes = [8, 8], strides = [1, 1]} : vector<8x32xf32> to vector<8x8xf32>
    %35 = arith.truncf %34 : vector<8x8xf32> to vector<8x8xbf16>
    %cst_14 = arith.constant 0xFF800000 : f32
    %36 = vector.broadcast %cst_14 : f32 to vector<8x1xf32>
    %cst_15 = arith.constant 0.000000e+00 : f32
    %37 = vector.broadcast %cst_15 : f32 to vector<8x1xf32>
    %cst_16 = arith.constant 0.000000e+00 : f32
    %38 = vector.broadcast %cst_16 : f32 to vector<8x8xf32>
    %39 = vector.extract_strided_slice %32 {offsets = [0, 0], sizes = [8, 8], strides = [1, 1]} : vector<8x32xf32> to vector<8x8xf32>
    %40 = arith.truncf %39 : vector<8x8xf32> to vector<8x8xbf16>
    %41 = vector.extract_strided_slice %33 {offsets = [0, 0], sizes = [8, 8], strides = [1, 1]} : vector<8x32xf32> to vector<8x8xf32>
    %42 = arith.truncf %41 : vector<8x8xf32> to vector<8x8xbf16>
    %cst_17 = arith.constant dense<0.000000e+00> : vector<8x8xf32>
    %43 = tpu.matmul %35, %40, %cst_17 {dimension_numbers = #tpu.dot_dimension_numbers<[1], [1], [0], [0], [0, 0, 1, 0], [], []>} : vector<8x8xbf16>, vector<8x8xbf16>, vector<8x8xf32> -> vector<8x8xf32>
    %cst_18 = arith.constant dense<0xFF800000> : vector<8xf32>
    %44 = vector.multi_reduction <maximumf>, %43, %cst_18 [1] : vector<8x8xf32> to vector<8xf32>
    %45 = vector.shape_cast %44 : vector<8xf32> to vector<8x1xf32>
    %46 = arith.maximumf %36, %45 : vector<8x1xf32>
    %47 = arith.subf %36, %46 : vector<8x1xf32>
    %48 = math.exp %47 : vector<8x1xf32>
    %49 = vector.broadcast %46 : vector<8x1xf32> to vector<8x8xf32>
    %50 = arith.subf %43, %49 : vector<8x8xf32>
    %51 = math.exp %50 : vector<8x8xf32>
    %52 = arith.mulf %48, %37 : vector<8x1xf32>
    %cst_19 = arith.constant dense<0.000000e+00> : vector<8xf32>
    %53 = vector.multi_reduction <add>, %51, %cst_19 [1] : vector<8x8xf32> to vector<8xf32>
    %54 = vector.shape_cast %53 : vector<8xf32> to vector<8x1xf32>
    %55 = arith.addf %52, %54 : vector<8x1xf32>
    %56 = vector.broadcast %48 : vector<8x1xf32> to vector<8x8xf32>
    %57 = arith.mulf %56, %38 : vector<8x8xf32>
    %58 = arith.truncf %51 : vector<8x8xf32> to vector<8x8xbf16>
    %cst_20 = arith.constant dense<0.000000e+00> : vector<8x8xf32>
    %59 = tpu.matmul %58, %42, %cst_20 {dimension_numbers = #tpu.dot_dimension_numbers<[1], [0], [0], [1], [0, 0, 1, 1], [], []>} : vector<8x8xbf16>, vector<8x8xbf16>, vector<8x8xf32> -> vector<8x8xf32>
    %60 = arith.addf %57, %59 : vector<8x8xf32>
    %61 = tpu.reciprocal %55 {approx = true} : vector<8x1xf32> -> vector<8x1xf32>
    %62 = vector.broadcast %61 : vector<8x1xf32> to vector<8x8xf32>
    %63 = arith.mulf %60, %62 : vector<8x8xf32>
    %64 = vector.extract_strided_slice %31 {offsets = [0, 8], sizes = [8, 8], strides = [1, 1]} : vector<8x32xf32> to vector<8x8xf32>
    %65 = arith.truncf %64 : vector<8x8xf32> to vector<8x8xbf16>
    %cst_21 = arith.constant 0xFF800000 : f32
    %66 = vector.broadcast %cst_21 : f32 to vector<8x1xf32>
    %cst_22 = arith.constant 0.000000e+00 : f32
    %67 = vector.broadcast %cst_22 : f32 to vector<8x1xf32>
    %cst_23 = arith.constant 0.000000e+00 : f32
    %68 = vector.broadcast %cst_23 : f32 to vector<8x8xf32>
    %69 = vector.extract_strided_slice %32 {offsets = [0, 8], sizes = [8, 8], strides = [1, 1]} : vector<8x32xf32> to vector<8x8xf32>
    %70 = arith.truncf %69 : vector<8x8xf32> to vector<8x8xbf16>
    %71 = vector.extract_strided_slice %33 {offsets = [0, 8], sizes = [8, 8], strides = [1, 1]} : vector<8x32xf32> to vector<8x8xf32>
    %72 = arith.truncf %71 : vector<8x8xf32> to vector<8x8xbf16>
    %cst_24 = arith.constant dense<0.000000e+00> : vector<8x8xf32>
    %73 = tpu.matmul %65, %70, %cst_24 {dimension_numbers = #tpu.dot_dimension_numbers<[1], [1], [0], [0], [0, 0, 1, 0], [], []>} : vector<8x8xbf16>, vector<8x8xbf16>, vector<8x8xf32> -> vector<8x8xf32>
    %cst_25 = arith.constant dense<0xFF800000> : vector<8xf32>
    %74 = vector.multi_reduction <maximumf>, %73, %cst_25 [1] : vector<8x8xf32> to vector<8xf32>
    %75 = vector.shape_cast %74 : vector<8xf32> to vector<8x1xf32>
    %76 = arith.maximumf %66, %75 : vector<8x1xf32>
    %77 = arith.subf %66, %76 : vector<8x1xf32>
    %78 = math.exp %77 : vector<8x1xf32>
    %79 = vector.broadcast %76 : vector<8x1xf32> to vector<8x8xf32>
    %80 = arith.subf %73, %79 : vector<8x8xf32>
    %81 = math.exp %80 : vector<8x8xf32>
    %82 = arith.mulf %78, %67 : vector<8x1xf32>
    %cst_26 = arith.constant dense<0.000000e+00> : vector<8xf32>
    %83 = vector.multi_reduction <add>, %81, %cst_26 [1] : vector<8x8xf32> to vector<8xf32>
    %84 = vector.shape_cast %83 : vector<8xf32> to vector<8x1xf32>
    %85 = arith.addf %82, %84 : vector<8x1xf32>
    %86 = vector.broadcast %78 : vector<8x1xf32> to vector<8x8xf32>
    %87 = arith.mulf %86, %68 : vector<8x8xf32>
    %88 = arith.truncf %81 : vector<8x8xf32> to vector<8x8xbf16>
    %cst_27 = arith.constant dense<0.000000e+00> : vector<8x8xf32>
    %89 = tpu.matmul %88, %72, %cst_27 {dimension_numbers = #tpu.dot_dimension_numbers<[1], [0], [0], [1], [0, 0, 1, 1], [], []>} : vector<8x8xbf16>, vector<8x8xbf16>, vector<8x8xf32> -> vector<8x8xf32>
    %90 = arith.addf %87, %89 : vector<8x8xf32>
    %91 = tpu.reciprocal %85 {approx = true} : vector<8x1xf32> -> vector<8x1xf32>
    %92 = vector.broadcast %91 : vector<8x1xf32> to vector<8x8xf32>
    %93 = arith.mulf %90, %92 : vector<8x8xf32>
    %94 = vector.extract_strided_slice %31 {offsets = [0, 16], sizes = [8, 8], strides = [1, 1]} : vector<8x32xf32> to vector<8x8xf32>
    %95 = arith.truncf %94 : vector<8x8xf32> to vector<8x8xbf16>
    %cst_28 = arith.constant 0xFF800000 : f32
    %96 = vector.broadcast %cst_28 : f32 to vector<8x1xf32>
    %cst_29 = arith.constant 0.000000e+00 : f32
    %97 = vector.broadcast %cst_29 : f32 to vector<8x1xf32>
    %cst_30 = arith.constant 0.000000e+00 : f32
    %98 = vector.broadcast %cst_30 : f32 to vector<8x8xf32>
    %99 = vector.extract_strided_slice %32 {offsets = [0, 16], sizes = [8, 8], strides = [1, 1]} : vector<8x32xf32> to vector<8x8xf32>
    %100 = arith.truncf %99 : vector<8x8xf32> to vector<8x8xbf16>
    %101 = vector.extract_strided_slice %33 {offsets = [0, 16], sizes = [8, 8], strides = [1, 1]} : vector<8x32xf32> to vector<8x8xf32>
    %102 = arith.truncf %101 : vector<8x8xf32> to vector<8x8xbf16>
    %cst_31 = arith.constant dense<0.000000e+00> : vector<8x8xf32>
    %103 = tpu.matmul %95, %100, %cst_31 {dimension_numbers = #tpu.dot_dimension_numbers<[1], [1], [0], [0], [0, 0, 1, 0], [], []>} : vector<8x8xbf16>, vector<8x8xbf16>, vector<8x8xf32> -> vector<8x8xf32>
    %cst_32 = arith.constant dense<0xFF800000> : vector<8xf32>
    %104 = vector.multi_reduction <maximumf>, %103, %cst_32 [1] : vector<8x8xf32> to vector<8xf32>
    %105 = vector.shape_cast %104 : vector<8xf32> to vector<8x1xf32>
    %106 = arith.maximumf %96, %105 : vector<8x1xf32>
    %107 = arith.subf %96, %106 : vector<8x1xf32>
    %108 = math.exp %107 : vector<8x1xf32>
    %109 = vector.broadcast %106 : vector<8x1xf32> to vector<8x8xf32>
    %110 = arith.subf %103, %109 : vector<8x8xf32>
    %111 = math.exp %110 : vector<8x8xf32>
    %112 = arith.mulf %108, %97 : vector<8x1xf32>
    %cst_33 = arith.constant dense<0.000000e+00> : vector<8xf32>
    %113 = vector.multi_reduction <add>, %111, %cst_33 [1] : vector<8x8xf32> to vector<8xf32>
    %114 = vector.shape_cast %113 : vector<8xf32> to vector<8x1xf32>
    %115 = arith.addf %112, %114 : vector<8x1xf32>
    %116 = vector.broadcast %108 : vector<8x1xf32> to vector<8x8xf32>
    %117 = arith.mulf %116, %98 : vector<8x8xf32>
    %118 = arith.truncf %111 : vector<8x8xf32> to vector<8x8xbf16>
    %cst_34 = arith.constant dense<0.000000e+00> : vector<8x8xf32>
    %119 = tpu.matmul %118, %102, %cst_34 {dimension_numbers = #tpu.dot_dimension_numbers<[1], [0], [0], [1], [0, 0, 1, 1], [], []>} : vector<8x8xbf16>, vector<8x8xbf16>, vector<8x8xf32> -> vector<8x8xf32>
    %120 = arith.addf %117, %119 : vector<8x8xf32>
    %121 = tpu.reciprocal %115 {approx = true} : vector<8x1xf32> -> vector<8x1xf32>
    %122 = vector.broadcast %121 : vector<8x1xf32> to vector<8x8xf32>
    %123 = arith.mulf %120, %122 : vector<8x8xf32>
    %124 = vector.extract_strided_slice %31 {offsets = [0, 24], sizes = [8, 8], strides = [1, 1]} : vector<8x32xf32> to vector<8x8xf32>
    %125 = arith.truncf %124 : vector<8x8xf32> to vector<8x8xbf16>
    %cst_35 = arith.constant 0xFF800000 : f32
    %126 = vector.broadcast %cst_35 : f32 to vector<8x1xf32>
    %cst_36 = arith.constant 0.000000e+00 : f32
    %127 = vector.broadcast %cst_36 : f32 to vector<8x1xf32>
    %cst_37 = arith.constant 0.000000e+00 : f32
    %128 = vector.broadcast %cst_37 : f32 to vector<8x8xf32>
    %129 = vector.extract_strided_slice %32 {offsets = [0, 24], sizes = [8, 8], strides = [1, 1]} : vector<8x32xf32> to vector<8x8xf32>
    %130 = arith.truncf %129 : vector<8x8xf32> to vector<8x8xbf16>
    %131 = vector.extract_strided_slice %33 {offsets = [0, 24], sizes = [8, 8], strides = [1, 1]} : vector<8x32xf32> to vector<8x8xf32>
    %132 = arith.truncf %131 : vector<8x8xf32> to vector<8x8xbf16>
    %cst_38 = arith.constant dense<0.000000e+00> : vector<8x8xf32>
    %133 = tpu.matmul %125, %130, %cst_38 {dimension_numbers = #tpu.dot_dimension_numbers<[1], [1], [0], [0], [0, 0, 1, 0], [], []>} : vector<8x8xbf16>, vector<8x8xbf16>, vector<8x8xf32> -> vector<8x8xf32>
    %cst_39 = arith.constant dense<0xFF800000> : vector<8xf32>
    %134 = vector.multi_reduction <maximumf>, %133, %cst_39 [1] : vector<8x8xf32> to vector<8xf32>
    %135 = vector.shape_cast %134 : vector<8xf32> to vector<8x1xf32>
    %136 = arith.maximumf %126, %135 : vector<8x1xf32>
    %137 = arith.subf %126, %136 : vector<8x1xf32>
    %138 = math.exp %137 : vector<8x1xf32>
    %139 = vector.broadcast %136 : vector<8x1xf32> to vector<8x8xf32>
    %140 = arith.subf %133, %139 : vector<8x8xf32>
    %141 = math.exp %140 : vector<8x8xf32>
    %142 = arith.mulf %138, %127 : vector<8x1xf32>
    %cst_40 = arith.constant dense<0.000000e+00> : vector<8xf32>
    %143 = vector.multi_reduction <add>, %141, %cst_40 [1] : vector<8x8xf32> to vector<8xf32>
    %144 = vector.shape_cast %143 : vector<8xf32> to vector<8x1xf32>
    %145 = arith.addf %142, %144 : vector<8x1xf32>
    %146 = vector.broadcast %138 : vector<8x1xf32> to vector<8x8xf32>
    %147 = arith.mulf %146, %128 : vector<8x8xf32>
    %148 = arith.truncf %141 : vector<8x8xf32> to vector<8x8xbf16>
    %cst_41 = arith.constant dense<0.000000e+00> : vector<8x8xf32>
    %149 = tpu.matmul %148, %132, %cst_41 {dimension_numbers = #tpu.dot_dimension_numbers<[1], [0], [0], [1], [0, 0, 1, 1], [], []>} : vector<8x8xbf16>, vector<8x8xbf16>, vector<8x8xf32> -> vector<8x8xf32>
    %150 = arith.addf %147, %149 : vector<8x8xf32>
    %151 = tpu.reciprocal %145 {approx = true} : vector<8x1xf32> -> vector<8x1xf32>
    %152 = vector.broadcast %151 : vector<8x1xf32> to vector<8x8xf32>
    %153 = arith.mulf %150, %152 : vector<8x8xf32>
    %154 = tpu.concatenate %63, %93, %123, %153 in 1 : vector<8x8xf32>, vector<8x8xf32>, vector<8x8xf32>, vector<8x8xf32> -> vector<8x32xf32>
    %155 = arith.truncf %154 : vector<8x32xf32> to vector<8x32xbf16>
    %c0_42 = arith.constant 0 : index
    %c0_43 = arith.constant 0 : index
    %156 = vector.load %arg5[%c0_42, %c0_43] : memref<32x32xbf16, #tpu.memory_space<vmem>>, vector<32x32xbf16>
    %cst_44 = arith.constant dense<0.000000e+00> : vector<8x32xf32>
    %157 = tpu.matmul %155, %156, %cst_44 {dimension_numbers = #tpu.dot_dimension_numbers<[1], [0], [0], [1], [0, 0, 1, 1], [], []>} : vector<8x32xbf16>, vector<32x32xbf16>, vector<8x32xf32> -> vector<8x32xf32>
    %c0_45 = arith.constant 0 : index
    %c0_46 = arith.constant 0 : index
    %158 = vector.load %arg6[%c0_45, %c0_46] : memref<1x32xf32, #tpu.memory_space<vmem>>, vector<1x32xf32>
    %159 = vector.broadcast %158 : vector<1x32xf32> to vector<8x32xf32>
    %160 = arith.addf %157, %159 : vector<8x32xf32>
    %161 = arith.addf %1, %160 : vector<8x32xf32>
    %c0_47 = arith.constant 0 : index
    %c0_48 = arith.constant 0 : index
    %162 = vector.load %arg7[%c0_47, %c0_48] : memref<1x32xf32, #tpu.memory_space<vmem>>, vector<1x32xf32>
    %c0_49 = arith.constant 0 : index
    %c0_50 = arith.constant 0 : index
    %163 = vector.load %arg8[%c0_49, %c0_50] : memref<1x32xf32, #tpu.memory_space<vmem>>, vector<1x32xf32>
    %cst_51 = arith.constant dense<0.000000e+00> : vector<8xf32>
    %164 = vector.multi_reduction <add>, %161, %cst_51 [1] : vector<8x32xf32> to vector<8xf32>
    %165 = vector.shape_cast %164 : vector<8xf32> to vector<8x1xf32>
    %cst_52 = arith.constant 3.200000e+01 : f32
    %166 = vector.broadcast %cst_52 : f32 to vector<8x1xf32>
    %167 = arith.divf %165, %166 : vector<8x1xf32>
    %168 = vector.broadcast %167 : vector<8x1xf32> to vector<8x32xf32>
    %169 = arith.subf %161, %168 : vector<8x32xf32>
    %170 = arith.mulf %169, %169 : vector<8x32xf32>
    %cst_53 = arith.constant dense<0.000000e+00> : vector<8xf32>
    %171 = vector.multi_reduction <add>, %170, %cst_53 [1] : vector<8x32xf32> to vector<8xf32>
    %172 = vector.shape_cast %171 : vector<8xf32> to vector<8x1xf32>
    %cst_54 = arith.constant 3.200000e+01 : f32
    %173 = vector.broadcast %cst_54 : f32 to vector<8x1xf32>
    %174 = arith.divf %172, %173 : vector<8x1xf32>
    %175 = vector.broadcast %167 : vector<8x1xf32> to vector<8x32xf32>
    %176 = arith.subf %161, %175 : vector<8x32xf32>
    %cst_55 = arith.constant 9.99999974E-6 : f32
    %177 = vector.broadcast %cst_55 : f32 to vector<8x1xf32>
    %178 = arith.addf %174, %177 : vector<8x1xf32>
    %179 = math.rsqrt %178 : vector<8x1xf32>
    %180 = vector.broadcast %179 : vector<8x1xf32> to vector<8x32xf32>
    %181 = arith.mulf %176, %180 : vector<8x32xf32>
    %182 = vector.broadcast %162 : vector<1x32xf32> to vector<8x32xf32>
    %183 = arith.mulf %181, %182 : vector<8x32xf32>
    %184 = vector.broadcast %163 : vector<1x32xf32> to vector<8x32xf32>
    %185 = arith.addf %183, %184 : vector<8x32xf32>
    %186 = arith.truncf %185 : vector<8x32xf32> to vector<8x32xbf16>
    %c0_56 = arith.constant 0 : index
    %c0_57 = arith.constant 0 : index
    %187 = vector.load %arg9[%c0_56, %c0_57] : memref<32x64xbf16, #tpu.memory_space<vmem>>, vector<32x64xbf16>
    %cst_58 = arith.constant dense<0.000000e+00> : vector<8x64xf32>
    %188 = tpu.matmul %186, %187, %cst_58 {dimension_numbers = #tpu.dot_dimension_numbers<[1], [0], [0], [1], [0, 0, 1, 1], [], []>} : vector<8x32xbf16>, vector<32x64xbf16>, vector<8x64xf32> -> vector<8x64xf32>
    %c0_59 = arith.constant 0 : index
    %c0_60 = arith.constant 0 : index
    %189 = vector.load %arg10[%c0_59, %c0_60] : memref<1x64xf32, #tpu.memory_space<vmem>>, vector<1x64xf32>
    %190 = vector.broadcast %189 : vector<1x64xf32> to vector<8x64xf32>
    %191 = arith.addf %188, %190 : vector<8x64xf32>
    %cst_61 = arith.constant 5.000000e-01 : f32
    %192 = vector.broadcast %cst_61 : f32 to vector<8x64xf32>
    %193 = arith.mulf %192, %191 : vector<8x64xf32>
    %cst_62 = arith.constant 4.471500e-02 : f32
    %194 = vector.broadcast %cst_62 : f32 to vector<8x64xf32>
    %195 = arith.mulf %194, %191 : vector<8x64xf32>
    %196 = arith.mulf %195, %191 : vector<8x64xf32>
    %197 = arith.mulf %196, %191 : vector<8x64xf32>
    %198 = arith.addf %191, %197 : vector<8x64xf32>
    %cst_63 = arith.constant 0.797884583 : f32
    %199 = vector.broadcast %cst_63 : f32 to vector<8x64xf32>
    %200 = arith.mulf %199, %198 : vector<8x64xf32>
    %201 = math.tanh %200 : vector<8x64xf32>
    %cst_64 = arith.constant 1.000000e+00 : f32
    %202 = vector.broadcast %cst_64 : f32 to vector<8x64xf32>
    %203 = arith.addf %202, %201 : vector<8x64xf32>
    %204 = arith.mulf %193, %203 : vector<8x64xf32>
    %205 = arith.truncf %204 : vector<8x64xf32> to vector<8x64xbf16>
    %c0_65 = arith.constant 0 : index
    %c0_66 = arith.constant 0 : index
    %206 = vector.load %arg11[%c0_65, %c0_66] : memref<64x32xbf16, #tpu.memory_space<vmem>>, vector<64x32xbf16>
    %cst_67 = arith.constant dense<0.000000e+00> : vector<8x32xf32>
    %207 = tpu.matmul %205, %206, %cst_67 {dimension_numbers = #tpu.dot_dimension_numbers<[1], [0], [0], [1], [0, 0, 1, 1], [], []>} : vector<8x64xbf16>, vector<64x32xbf16>, vector<8x32xf32> -> vector<8x32xf32>
    %c0_68 = arith.constant 0 : index
    %c0_69 = arith.constant 0 : index
    %208 = vector.load %arg12[%c0_68, %c0_69] : memref<1x32xf32, #tpu.memory_space<vmem>>, vector<1x32xf32>
    %209 = vector.broadcast %208 : vector<1x32xf32> to vector<8x32xf32>
    %210 = arith.addf %207, %209 : vector<8x32xf32>
    %211 = arith.addf %161, %210 : vector<8x32xf32>
    %c0_70 = arith.constant 0 : index
    %c0_71 = arith.constant 0 : index
    %c0_72 = arith.constant 0 : index
    %212 = vector.load %arg13[%c0_70, %c0_71, %c0_72] : memref<1x8x32xf32, #tpu.memory_space<vmem>>, vector<1x8x32xf32>
    %213 = vector.shape_cast %212 : vector<1x8x32xf32> to vector<8x32xf32>
    %214 = vector.shape_cast %211 : vector<8x32xf32> to vector<1x8x32xf32>
    tpu.vector_store %arg13[%c0_70, %c0_71, %c0_72], %214 {strides = array<i32>} : memref<1x8x32xf32, #tpu.memory_space<vmem>>, vector<1x8x32xf32>,
    return
  }
  func.func @transform_0(%arg0: i32) -> (i32, i32, i32) {
    %c0_i32 = arith.constant 0 : i32
    %c0_i32_0 = arith.constant 0 : i32
    %c0_i32_1 = arith.constant 0 : i32
    return %arg0, %c0_i32, %c0_i32_0 : i32, i32, i32
  }
  func.func @transform_1(%arg0: i32) -> (i32, i32) {
    %c0_i32 = arith.constant 0 : i32
    %c0_i32_0 = arith.constant 0 : i32
    %c0_i32_1 = arith.constant 0 : i32
    return %c0_i32, %c0_i32_0 : i32, i32
  }
  func.func @transform_2(%arg0: i32) -> (i32, i32) {
    %c0_i32 = arith.constant 0 : i32
    %c0_i32_0 = arith.constant 0 : i32
    %c0_i32_1 = arith.constant 0 : i32
    return %c0_i32, %c0_i32_0 : i32, i32
  }
  func.func @transform_3(%arg0: i32) -> (i32, i32) {
    %c0_i32 = arith.constant 0 : i32
    %c0_i32_0 = arith.constant 0 : i32
    %c0_i32_1 = arith.constant 0 : i32
    return %c0_i32, %c0_i32_0 : i32, i32
  }
  func.func @transform_4(%arg0: i32) -> (i32, i32) {
    %c0_i32 = arith.constant 0 : i32
    %c0_i32_0 = arith.constant 0 : i32
    %c0_i32_1 = arith.constant 0 : i32
    return %c0_i32, %c0_i32_0 : i32, i32
  }
  func.func @transform_5(%arg0: i32) -> (i32, i32) {
    %c0_i32 = arith.constant 0 : i32
    %c0_i32_0 = arith.constant 0 : i32
    %c0_i32_1 = arith.constant 0 : i32
    return %c0_i32, %c0_i32_0 : i32, i32
  }
  func.func @transform_6(%arg0: i32) -> (i32, i32) {
    %c0_i32 = arith.constant 0 : i32
    %c0_i32_0 = arith.constant 0 : i32
    %c0_i32_1 = arith.constant 0 : i32
    return %c0_i32, %c0_i32_0 : i32, i32
  }
  func.func @transform_7(%arg0: i32) -> (i32, i32) {
    %c0_i32 = arith.constant 0 : i32
    %c0_i32_0 = arith.constant 0 : i32
    %c0_i32_1 = arith.constant 0 : i32
    return %c0_i32, %c0_i32_0 : i32, i32
  }
  func.func @transform_8(%arg0: i32) -> (i32, i32) {
    %c0_i32 = arith.constant 0 : i32
    %c0_i32_0 = arith.constant 0 : i32
    %c0_i32_1 = arith.constant 0 : i32
    return %c0_i32, %c0_i32_0 : i32, i32
  }
  func.func @transform_9(%arg0: i32) -> (i32, i32) {
    %c0_i32 = arith.constant 0 : i32
    %c0_i32_0 = arith.constant 0 : i32
    %c0_i32_1 = arith.constant 0 : i32
    return %c0_i32, %c0_i32_0 : i32, i32
  }
  func.func @transform_10(%arg0: i32) -> (i32, i32) {
    %c0_i32 = arith.constant 0 : i32
    %c0_i32_0 = arith.constant 0 : i32
    %c0_i32_1 = arith.constant 0 : i32
    return %c0_i32, %c0_i32_0 : i32, i32
  }
  func.func @transform_11(%arg0: i32) -> (i32, i32) {
    %c0_i32 = arith.constant 0 : i32
    %c0_i32_0 = arith.constant 0 : i32
    %c0_i32_1 = arith.constant 0 : i32
    return %c0_i32, %c0_i32_0 : i32, i32
  }
  func.func @transform_12(%arg0: i32) -> (i32, i32, i32) {
    %c0_i32 = arith.constant 0 : i32
    %c0_i32_0 = arith.constant 0 : i32
    %c0_i32_1 = arith.constant 0 : i32
    return %arg0, %c0_i32, %c0_i32_0 : i32, i32, i32
  }
}

module attributes {stable_mosaic.version = 11 : i64} {
  func.func @layer_kernel(%arg0: i32, %arg1: memref<1x8x32xf32, #tpu.memory_space<vmem>>, %arg2: memref<1x32xf32, #tpu.memory_space<vmem>>, %arg3: memref<1x32xf32, #tpu.memory_space<vmem>>, %arg4: memref<32x96xbf16, #tpu.memory_space<vmem>>, %arg5: memref<32x32xbf16, #tpu.memory_space<vmem>>, %arg6: memref<1x32xf32, #tpu.memory_space<vmem>>, %arg7: memref<1x32xf32, #tpu.memory_space<vmem>>, %arg8: memref<1x32xf32, #tpu.memory_space<vmem>>, %arg9: memref<32x64xbf16, #tpu.memory_space<vmem>>, %arg10: memref<1x64xf32, #tpu.memory_space<vmem>>, %arg11: memref<64x32xbf16, #tpu.memory_space<vmem>>, %arg12: memref<1x32xf32, #tpu.memory_space<vmem>>, %arg13: memref<1x8x32xf32, #tpu.memory_space<vmem>>) attributes {dimension_semantics = [#tpu.dimension_semantics<parallel>], iteration_bounds = array<i64: 2>, scalar_prefetch = 0 : i64, scratch_operands = 0 : i64, tpu.core_type = #tpu.core_type<tc>, window_params = [{transform_indices = @transform_0, window_bounds = array<i64: 1, 8, 32>}, {pipeline_mode = #tpu.pipeline_mode<synchronous>, transform_indices = @transform_1, window_bounds = array<i64: 1, 32>}, {pipeline_mode = #tpu.pipeline_mode<synchronous>, transform_indices = @transform_2, window_bounds = array<i64: 1, 32>}, {pipeline_mode = #tpu.pipeline_mode<synchronous>, transform_indices = @transform_3, window_bounds = array<i64: 32, 96>}, {pipeline_mode = #tpu.pipeline_mode<synchronous>, transform_indices = @transform_4, window_bounds = array<i64: 32, 32>}, {pipeline_mode = #tpu.pipeline_mode<synchronous>, transform_indices = @transform_5, window_bounds = array<i64: 1, 32>}, {pipeline_mode = #tpu.pipeline_mode<synchronous>, transform_indices = @transform_6, window_bounds = array<i64: 1, 32>}, {pipeline_mode = #tpu.pipeline_mode<synchronous>, transform_indices = @transform_7, window_bounds = array<i64: 1, 32>}, {pipeline_mode = #tpu.pipeline_mode<synchronous>, transform_indices = @transform_8, window_bounds = array<i64: 32, 64>}, {pipeline_mode = #tpu.pipeline_mode<synchronous>, transform_indices = @transform_9, window_bounds = array<i64: 1, 64>}, {pipeline_mode = #tpu.pipeline_mode<synchronous>, transform_indices = @transform_10, window_bounds = array<i64: 64, 32>}, {pipeline_mode = #tpu.pipeline_mode<synchronous>, transform_indices = @transform_11, window_bounds = array<i64: 1, 32>}, {transform_indices = @transform_12, window_bounds = array<i64: 1, 8, 32>}]} {
    %c0 = arith.constant 0 : index
    %c0_0 = arith.constant 0 : index
    %c0_1 = arith.constant 0 : index
    %0 = vector.load %arg1[%c0, %c0_0, %c0_1] : memref<1x8x32xf32, #tpu.memory_space<vmem>>, vector<1x8x32xf32>
    %1 = vector.shape_cast %0 : vector<1x8x32xf32> to vector<8x32xf32>
    %c0_2 = arith.constant 0 : index
    %c0_3 = arith.constant 0 : index
    %2 = vector.load %arg2[%c0_2, %c0_3] : memref<1x32xf32, #tpu.memory_space<vmem>>, vector<1x32xf32>
    %c0_4 = arith.constant 0 : index
    %c0_5 = arith.constant 0 : index
    %3 = vector.load %arg3[%c0_4, %c0_5] : memref<1x32xf32, #tpu.memory_space<vmem>>, vector<1x32xf32>
    %cst = arith.constant dense<0.000000e+00> : vector<8xf32>
    %4 = vector.multi_reduction <add>, %1, %cst [1] : vector<8x32xf32> to vector<8xf32>
    %5 = vector.shape_cast %4 : vector<8xf32> to vector<8x1xf32>
    %cst_6 = arith.constant 3.200000e+01 : f32
    %6 = vector.broadcast %cst_6 : f32 to vector<8x1xf32>
    %7 = arith.divf %5, %6 : vector<8x1xf32>
    %8 = vector.broadcast %7 : vector<8x1xf32> to vector<8x32xf32>
    %9 = arith.subf %1, %8 : vector<8x32xf32>
    %10 = arith.mulf %9, %9 : vector<8x32xf32>
    %cst_7 = arith.constant dense<0.000000e+00> : vector<8xf32>
    %11 = vector.multi_reduction <add>, %10, %cst_7 [1] : vector<8x32xf32> to vector<8xf32>
    %12 = vector.shape_cast %11 : vector<8xf32> to vector<8x1xf32>
    %cst_8 = arith.constant 3.200000e+01 : f32
    %13 = vector.broadcast %cst_8 : f32 to vector<8x1xf32>
    %14 = arith.divf %12, %13 : vector<8x1xf32>
    %15 = vector.broadcast %7 : vector<8x1xf32> to vector<8x32xf32>
    %16 = arith.subf %1, %15 : vector<8x32xf32>
    %cst_9 = arith.constant 9.99999974E-6 : f32
    %17 = vector.broadcast %cst_9 : f32 to vector<8x1xf32>
    %18 = arith.addf %14, %17 : vector<8x1xf32>
    %19 = math.rsqrt %18 : vector<8x1xf32>
    %20 = vector.broadcast %19 : vector<8x1xf32> to vector<8x32xf32>
    %21 = arith.mulf %16, %20 : vector<8x32xf32>
    %22 = vector.broadcast %2 : vector<1x32xf32> to vector<8x32xf32>
    %23 = arith.mulf %21, %22 : vector<8x32xf32>
    %24 = vector.broadcast %3 : vector<1x32xf32> to vector<8x32xf32>
    %25 = arith.addf %23, %24 : vector<8x32xf32>
    %26 = arith.truncf %25 : vector<8x32xf32> to vector<8x32xbf16>
    %c0_10 = arith.constant 0 : index
    %c0_11 = arith.constant 0 : index
    %27 = vector.load %arg4[%c0_10, %c0_11] : memref<32x96xbf16, #tpu.memory_space<vmem>>, vector<32x96xbf16>
    %cst_12 = arith.constant dense<0.000000e+00> : vector<8x96xf32>
    %28 = tpu.matmul %26, %27, %cst_12 {dimension_numbers = #tpu.dot_dimension_numbers<[1], [0], [0], [1], [0, 0, 1, 1], [], []>} : vector<8x32xbf16>, vector<32x96xbf16>, vector<8x96xf32> -> vector<8x96xf32>
    %29 = vector.extract_strided_slice %28 {offsets = [0, 0], sizes = [8, 32], strides = [1, 1]} : vector<8x96xf32> to vector<8x32xf32>
    %cst_13 = arith.constant 0.353553385 : f32
    %30 = vector.broadcast %cst_13 : f32 to vector<8x32xf32>
    %31 = arith.mulf %29, %30 : vector<8x32xf32>
    %32 = vector.extract_strided_slice %28 {offsets = [0, 32], sizes = [8, 32], strides = [1, 1]} : vector<8x96xf32> to vector<8x32xf32>
    %33 = vector.extract_strided_slice %28 {offsets = [0, 64], sizes = [8, 32], strides = [1, 1]} : vector<8x96xf32> to vector<8x32xf32>
    %34 = vector.extract_strided_slice %31 {offsets = [0, 0], sizes = [8, 8], strides = [1, 1]} : vector<8x32xf32> to vector<8x8xf32>
    %35 = arith.truncf %34 : vector<8x8xf32> to vector<8x8xbf16>
    %cst_14 = arith.constant 0xFF800000 : f32
    %36 = vector.broadcast %cst_14 : f32 to vector<8x1xf32>
    %cst_15 = arith.constant 0.000000e+00 : f32
    %37 = vector.broadcast %cst_15 : f32 to vector<8x1xf32>
    %cst_16 = arith.constant 0.000000e+00 : f32
    %38 = vector.broadcast %cst_16 : f32 to vector<8x8xf32>
    %39 = vector.extract_strided_slice %32 {offsets = [0, 0], sizes = [8, 8], strides = [1, 1]} : vector<8x32xf32> to vector<8x8xf32>
    %40 = arith.truncf %39 : vector<8x8xf32> to vector<8x8xbf16>
    %41 = vector.extract_strided_slice %33 {offsets = [0, 0], sizes = [8, 8], strides = [1, 1]} : vector<8x32xf32> to vector<8x8xf32>
    %42 = arith.truncf %41 : vector<8x8xf32> to vector<8x8xbf16>
    %cst_17 = arith.constant dense<0.000000e+00> : vector<8x8xf32>
    %43 = tpu.matmul %35, %40, %cst_17 {dimension_numbers = #tpu.dot_dimension_numbers<[1], [1], [0], [0], [0, 0, 1, 0], [], []>} : vector<8x8xbf16>, vector<8x8xbf16>, vector<8x8xf32> -> vector<8x8xf32>
    %cst_18 = arith.constant dense<0xFF800000> : vector<8xf32>
    %44 = vector.multi_reduction <maximumf>, %43, %cst_18 [1] : vector<8x8xf32> to vector<8xf32>
    %45 = vector.shape_cast %44 : vector<8xf32> to vector<8x1xf32>
    %46 = arith.maximumf %36, %45 : vector<8x1xf32>
    %47 = arith.subf %36, %46 : vector<8x1xf32>
    %48 = math.exp %47 : vector<8x1xf32>
    %49 = vector.broadcast %46 : vector<8x1xf32> to vector<8x8xf32>
    %50 = arith.subf %43, %49 : vector<8x8xf32>
    %51 = math.exp %50 : vector<8x8xf32>
    %52 = arith.mulf %48, %37 : vector<8x1xf32>
    %cst_19 = arith.constant dense<0.000000e+00> : vector<8xf32>
    %53 = vector.multi_reduction <add>, %51, %cst_19 [1] : vector<8x8xf32> to vector<8xf32>
    %54 = vector.shape_cast %53 : vector<8xf32> to vector<8x1xf32>
    %55 = arith.addf %52, %54 : vector<8x1xf32>
    %56 = vector.broadcast %48 : vector<8x1xf32> to vector<8x8xf32>
    %57 = arith.mulf %56, %38 : vector<8x8xf32>
    %58 = arith.truncf %51 : vector<8x8xf32> to vector<8x8xbf16>
    %cst_20 = arith.constant dense<0.000000e+00> : vector<8x8xf32>
    %59 = tpu.matmul %58, %42, %cst_20 {dimension_numbers = #tpu.dot_dimension_numbers<[1], [0], [0], [1], [0, 0, 1, 1], [], []>} : vector<8x8xbf16>, vector<8x8xbf16>, vector<8x8xf32> -> vector<8x8xf32>
    %60 = arith.addf %57, %59 : vector<8x8xf32>
    %61 = tpu.reciprocal %55 {approx = true} : vector<8x1xf32> -> vector<8x1xf32>
    %62 = vector.broadcast %61 : vector<8x1xf32> to vector<8x8xf32>
    %63 = arith.mulf %60, %62 : vector<8x8xf32>
    %64 = vector.extract_strided_slice %31 {offsets = [0, 8], sizes = [8, 8], strides = [1, 1]} : vector<8x32xf32> to vector<8x8xf32>
    %65 = arith.truncf %64 : vector<8x8xf32> to vector<8x8xbf16>
    %cst_21 = arith.constant 0xFF800000 : f32
    %66 = vector.broadcast %cst_21 : f32 to vector<8x1xf32>
    %cst_22 = arith.constant 0.000000e+00 : f32
    %67 = vector.broadcast %cst_22 : f32 to vector<8x1xf32>
    %cst_23 = arith.constant 0.000000e+00 : f32
    %68 = vector.broadcast %cst_23 : f32 to vector<8x8xf32>
    %69 = vector.extract_strided_slice %32 {offsets = [0, 8], sizes = [8, 8], strides = [1, 1]} : vector<8x32xf32> to vector<8x8xf32>
    %70 = arith.truncf %69 : vector<8x8xf32> to vector<8x8xbf16>
    %71 = vector.extract_strided_slice %33 {offsets = [0, 8], sizes = [8, 8], strides = [1, 1]} : vector<8x32xf32> to vector<8x8xf32>
    %72 = arith.truncf %71 : vector<8x8xf32> to vector<8x8xbf16>
    %cst_24 = arith.constant dense<0.000000e+00> : vector<8x8xf32>
    %73 = tpu.matmul %65, %70, %cst_24 {dimension_numbers = #tpu.dot_dimension_numbers<[1], [1], [0], [0], [0, 0, 1, 0], [], []>} : vector<8x8xbf16>, vector<8x8xbf16>, vector<8x8xf32> -> vector<8x8xf32>
    %cst_25 = arith.constant dense<0xFF800000> : vector<8xf32>
    %74 = vector.multi_reduction <maximumf>, %73, %cst_25 [1] : vector<8x8xf32> to vector<8xf32>
    %75 = vector.shape_cast %74 : vector<8xf32> to vector<8x1xf32>
    %76 = arith.maximumf %66, %75 : vector<8x1xf32>
    %77 = arith.subf %66, %76 : vector<8x1xf32>
    %78 = math.exp %77 : vector<8x1xf32>
    %79 = vector.broadcast %76 : vector<8x1xf32> to vector<8x8xf32>
    %80 = arith.subf %73, %79 : vector<8x8xf32>
    %81 = math.exp %80 : vector<8x8xf32>
    %82 = arith.mulf %78, %67 : vector<8x1xf32>
    %cst_26 = arith.constant dense<0.000000e+00> : vector<8xf32>
    %83 = vector.multi_reduction <add>, %81, %cst_26 [1] : vector<8x8xf32> to vector<8xf32>
    %84 = vector.shape_cast %83 : vector<8xf32> to vector<8x1xf32>
    %85 = arith.addf %82, %84 : vector<8x1xf32>
    %86 = vector.broadcast %78 : vector<8x1xf32> to vector<8x8xf32>
    %87 = arith.mulf %86, %68 : vector<8x8xf32>
    %88 = arith.truncf %81 : vector<8x8xf32> to vector<8x8xbf16>
    %cst_27 = arith.constant dense<0.000000e+00> : vector<8x8xf32>
    %89 = tpu.matmul %88, %72, %cst_27 {dimension_numbers = #tpu.dot_dimension_numbers<[1], [0], [0], [1], [0, 0, 1, 1], [], []>} : vector<8x8xbf16>, vector<8x8xbf16>, vector<8x8xf32> -> vector<8x8xf32>
    %90 = arith.addf %87, %89 : vector<8x8xf32>
    %91 = tpu.reciprocal %85 {approx = true} : vector<8x1xf32> -> vector<8x1xf32>
    %92 = vector.broadcast %91 : vector<8x1xf32> to vector<8x8xf32>
    %93 = arith.mulf %90, %92 : vector<8x8xf32>
    %94 = vector.extract_strided_slice %31 {offsets = [0, 16], sizes = [8, 8], strides = [1, 1]} : vector<8x32xf32> to vector<8x8xf32>
    %95 = arith.truncf %94 : vector<8x8xf32> to vector<8x8xbf16>
    %cst_28 = arith.constant 0xFF800000 : f32
    %96 = vector.broadcast %cst_28 : f32 to vector<8x1xf32>
    %cst_29 = arith.constant 0.000000e+00 : f32
    %97 = vector.broadcast %cst_29 : f32 to vector<8x1xf32>
    %cst_30 = arith.constant 0.000000e+00 : f32
    %98 = vector.broadcast %cst_30 : f32 to vector<8x8xf32>
    %99 = vector.extract_strided_slice %32 {offsets = [0, 16], sizes = [8, 8], strides = [1, 1]} : vector<8x32xf32> to vector<8x8xf32>
    %100 = arith.truncf %99 : vector<8x8xf32> to vector<8x8xbf16>
    %101 = vector.extract_strided_slice %33 {offsets = [0, 16], sizes = [8, 8], strides = [1, 1]} : vector<8x32xf32> to vector<8x8xf32>
    %102 = arith.truncf %101 : vector<8x8xf32> to vector<8x8xbf16>
    %cst_31 = arith.constant dense<0.000000e+00> : vector<8x8xf32>
    %103 = tpu.matmul %95, %100, %cst_31 {dimension_numbers = #tpu.dot_dimension_numbers<[1], [1], [0], [0], [0, 0, 1, 0], [], []>} : vector<8x8xbf16>, vector<8x8xbf16>, vector<8x8xf32> -> vector<8x8xf32>
    %cst_32 = arith.constant dense<0xFF800000> : vector<8xf32>
    %104 = vector.multi_reduction <maximumf>, %103, %cst_32 [1] : vector<8x8xf32> to vector<8xf32>
    %105 = vector.shape_cast %104 : vector<8xf32> to vector<8x1xf32>
    %106 = arith.maximumf %96, %105 : vector<8x1xf32>
    %107 = arith.subf %96, %106 : vector<8x1xf32>
    %108 = math.exp %107 : vector<8x1xf32>
    %109 = vector.broadcast %106 : vector<8x1xf32> to vector<8x8xf32>
    %110 = arith.subf %103, %109 : vector<8x8xf32>
    %111 = math.exp %110 : vector<8x8xf32>
    %112 = arith.mulf %108, %97 : vector<8x1xf32>
    %cst_33 = arith.constant dense<0.000000e+00> : vector<8xf32>
    %113 = vector.multi_reduction <add>, %111, %cst_33 [1] : vector<8x8xf32> to vector<8xf32>
    %114 = vector.shape_cast %113 : vector<8xf32> to vector<8x1xf32>
    %115 = arith.addf %112, %114 : vector<8x1xf32>
    %116 = vector.broadcast %108 : vector<8x1xf32> to vector<8x8xf32>
    %117 = arith.mulf %116, %98 : vector<8x8xf32>
    %118 = arith.truncf %111 : vector<8x8xf32> to vector<8x8xbf16>
    %cst_34 = arith.constant dense<0.000000e+00> : vector<8x8xf32>
    %119 = tpu.matmul %118, %102, %cst_34 {dimension_numbers = #tpu.dot_dimension_numbers<[1], [0], [0], [1], [0, 0, 1, 1], [], []>} : vector<8x8xbf16>, vector<8x8xbf16>, vector<8x8xf32> -> vector<8x8xf32>
    %120 = arith.addf %117, %119 : vector<8x8xf32>
    %121 = tpu.reciprocal %115 {approx = true} : vector<8x1xf32> -> vector<8x1xf32>
    %122 = vector.broadcast %121 : vector<8x1xf32> to vector<8x8xf32>
    %123 = arith.mulf %120, %122 : vector<8x8xf32>
    %124 = vector.extract_strided_slice %31 {offsets = [0, 24], sizes = [8, 8], strides = [1, 1]} : vector<8x32xf32> to vector<8x8xf32>
    %125 = arith.truncf %124 : vector<8x8xf32> to vector<8x8xbf16>
    %cst_35 = arith.constant 0xFF800000 : f32
    %126 = vector.broadcast %cst_35 : f32 to vector<8x1xf32>
    %cst_36 = arith.constant 0.000000e+00 : f32
    %127 = vector.broadcast %cst_36 : f32 to vector<8x1xf32>
    %cst_37 = arith.constant 0.000000e+00 : f32
    %128 = vector.broadcast %cst_37 : f32 to vector<8x8xf32>
    %129 = vector.extract_strided_slice %32 {offsets = [0, 24], sizes = [8, 8], strides = [1, 1]} : vector<8x32xf32> to vector<8x8xf32>
    %130 = arith.truncf %129 : vector<8x8xf32> to vector<8x8xbf16>
    %131 = vector.extract_strided_slice %33 {offsets = [0, 24], sizes = [8, 8], strides = [1, 1]} : vector<8x32xf32> to vector<8x8xf32>
    %132 = arith.truncf %131 : vector<8x8xf32> to vector<8x8xbf16>
    %cst_38 = arith.constant dense<0.000000e+00> : vector<8x8xf32>
    %133 = tpu.matmul %125, %130, %cst_38 {dimension_numbers = #tpu.dot_dimension_numbers<[1], [1], [0], [0], [0, 0, 1, 0], [], []>} : vector<8x8xbf16>, vector<8x8xbf16>, vector<8x8xf32> -> vector<8x8xf32>
    %cst_39 = arith.constant dense<0xFF800000> : vector<8xf32>
    %134 = vector.multi_reduction <maximumf>, %133, %cst_39 [1] : vector<8x8xf32> to vector<8xf32>
    %135 = vector.shape_cast %134 : vector<8xf32> to vector<8x1xf32>
    %136 = arith.maximumf %126, %135 : vector<8x1xf32>
    %137 = arith.subf %126, %136 : vector<8x1xf32>
    %138 = math.exp %137 : vector<8x1xf32>
    %139 = vector.broadcast %136 : vector<8x1xf32> to vector<8x8xf32>
    %140 = arith.subf %133, %139 : vector<8x8xf32>
    %141 = math.exp %140 : vector<8x8xf32>
    %142 = arith.mulf %138, %127 : vector<8x1xf32>
    %cst_40 = arith.constant dense<0.000000e+00> : vector<8xf32>
    %143 = vector.multi_reduction <add>, %141, %cst_40 [1] : vector<8x8xf32> to vector<8xf32>
    %144 = vector.shape_cast %143 : vector<8xf32> to vector<8x1xf32>
    %145 = arith.addf %142, %144 : vector<8x1xf32>
    %146 = vector.broadcast %138 : vector<8x1xf32> to vector<8x8xf32>
    %147 = arith.mulf %146, %128 : vector<8x8xf32>
    %148 = arith.truncf %141 : vector<8x8xf32> to vector<8x8xbf16>
    %cst_41 = arith.constant dense<0.000000e+00> : vector<8x8xf32>
    %149 = tpu.matmul %148, %132, %cst_41 {dimension_numbers = #tpu.dot_dimension_numbers<[1], [0], [0], [1], [0, 0, 1, 1], [], []>} : vector<8x8xbf16>, vector<8x8xbf16>, vector<8x8xf32> -> vector<8x8xf32>
    %150 = arith.addf %147, %149 : vector<8x8xf32>
    %151 = tpu.reciprocal %145 {approx = true} : vector<8x1xf32> -> vector<8x1xf32>
    %152 = vector.broadcast %151 : vector<8x1xf32> to vector<8x8xf32>
    %153 = arith.mulf %150, %152 : vector<8x8xf32>
    %154 = tpu.concatenate %63, %93, %123, %153 in 1 : vector<8x8xf32>, vector<8x8xf32>, vector<8x8xf32>, vector<8x8xf32> -> vector<8x32xf32>
    %155 = arith.truncf %154 : vector<8x32xf32> to vector<8x32xbf16>
    %c0_42 = arith.constant 0 : index
    %c0_43 = arith.constant 0 : index
    %156 = vector.load %arg5[%c0_42, %c0_43] : memref<32x32xbf16, #tpu.memory_space<vmem>>, vector<32x32xbf16>
    %cst_44 = arith.constant dense<0.000000e+00> : vector<8x32xf32>
    %157 = tpu.matmul %155, %156, %cst_44 {dimension_numbers = #tpu.dot_dimension_numbers<[1], [0], [0], [1], [0, 0, 1, 1], [], []>} : vector<8x32xbf16>, vector<32x32xbf16>, vector<8x32xf32> -> vector<8x32xf32>
    %c0_45 = arith.constant 0 : index
    %c0_46 = arith.constant 0 : index
    %158 = vector.load %arg6[%c0_45, %c0_46] : memref<1x32xf32, #tpu.memory_space<vmem>>, vector<1x32xf32>
    %159 = vector.broadcast %158 : vector<1x32xf32> to vector<8x32xf32>
    %160 = arith.addf %157, %159 : vector<8x32xf32>
    %161 = arith.addf %1, %160 : vector<8x32xf32>
    %c0_47 = arith.constant 0 : index
    %c0_48 = arith.constant 0 : index
    %162 = vector.load %arg7[%c0_47, %c0_48] : memref<1x32xf32, #tpu.memory_space<vmem>>, vector<1x32xf32>
    %c0_49 = arith.constant 0 : index
    %c0_50 = arith.constant 0 : index
    %163 = vector.load %arg8[%c0_49, %c0_50] : memref<1x32xf32, #tpu.memory_space<vmem>>, vector<1x32xf32>
    %cst_51 = arith.constant dense<0.000000e+00> : vector<8xf32>
    %164 = vector.multi_reduction <add>, %161, %cst_51 [1] : vector<8x32xf32> to vector<8xf32>
    %165 = vector.shape_cast %164 : vector<8xf32> to vector<8x1xf32>
    %cst_52 = arith.constant 3.200000e+01 : f32
    %166 = vector.broadcast %cst_52 : f32 to vector<8x1xf32>
    %167 = arith.divf %165, %166 : vector<8x1xf32>
    %168 = vector.broadcast %167 : vector<8x1xf32> to vector<8x32xf32>
    %169 = arith.subf %161, %168 : vector<8x32xf32>
    %170 = arith.mulf %169, %169 : vector<8x32xf32>
    %cst_53 = arith.constant dense<0.000000e+00> : vector<8xf32>
    %171 = vector.multi_reduction <add>, %170, %cst_53 [1] : vector<8x32xf32> to vector<8xf32>
    %172 = vector.shape_cast %171 : vector<8xf32> to vector<8x1xf32>
    %cst_54 = arith.constant 3.200000e+01 : f32
    %173 = vector.broadcast %cst_54 : f32 to vector<8x1xf32>
    %174 = arith.divf %172, %173 : vector<8x1xf32>
    %175 = vector.broadcast %167 : vector<8x1xf32> to vector<8x32xf32>
    %176 = arith.subf %161, %175 : vector<8x32xf32>
    %cst_55 = arith.constant 9.99999974E-6 : f32
    %177 = vector.broadcast %cst_55 : f32 to vector<8x1xf32>
    %178 = arith.addf %174, %177 : vector<8x1xf32>
    %179 = math.rsqrt %178 : vector<8x1xf32>
    %180 = vector.broadcast %179 : vector<8x1xf32> to vector<8x32xf32>
    %181 = arith.mulf %176, %180 : vector<8x32xf32>
    %182 = vector.broadcast %162 : vector<1x32xf32> to vector<8x32xf32>
    %183 = arith.mulf %181, %182 : vector<8x32xf32>
    %184 = vector.broadcast %163 : vector<1x32xf32> to vector<8x32xf32>
    %185 = arith.addf %183, %184 : vector<8x32xf32>
    %186 = arith.truncf %185 : vector<8x32xf32> to vector<8x32xbf16>
    %c0_56 = arith.constant 0 : index
    %c0_57 = arith.constant 0 : index
    %187 = vector.load %arg9[%c0_56, %c0_57] : memref<32x64xbf16, #tpu.memory_space<vmem>>, vector<32x64xbf16>
    %cst_58 = arith.constant dense<0.000000e+00> : vector<8x64xf32>
    %188 = tpu.matmul %186, %187, %cst_58 {dimension_numbers = #tpu.dot_dimension_numbers<[1], [0], [0], [1], [0, 0, 1, 1], [], []>} : vector<8x32xbf16>, vector<32x64xbf16>, vector<8x64xf32> -> vector<8x64xf32>
    %c0_59 = arith.constant 0 : index
    %c0_60 = arith.constant 0 : index
    %189 = vector.load %arg10[%c0_59, %c0_60] : memref<1x64xf32, #tpu.memory_space<vmem>>, vector<1x64xf32>
    %190 = vector.broadcast %189 : vector<1x64xf32> to vector<8x64xf32>
    %191 = arith.addf %188, %190 : vector<8x64xf32>
    %cst_61 = arith.constant 5.000000e-01 : f32
    %192 = vector.broadcast %cst_61 : f32 to vector<8x64xf32>
    %193 = arith.mulf %192, %191 : vector<8x64xf32>
    %cst_62 = arith.constant 4.471500e-02 : f32
    %194 = vector.broadcast %cst_62 : f32 to vector<8x64xf32>
    %195 = arith.mulf %194, %191 : vector<8x64xf32>
    %196 = arith.mulf %195, %191 : vector<8x64xf32>
    %197 = arith.mulf %196, %191 : vector<8x64xf32>
    %198 = arith.addf %191, %197 : vector<8x64xf32>
    %cst_63 = arith.constant 0.797884583 : f32
    %199 = vector.broadcast %cst_63 : f32 to vector<8x64xf32>
    %200 = arith.mulf %199, %198 : vector<8x64xf32>
    %201 = math.tanh %200 : vector<8x64xf32>
    %cst_64 = arith.constant 1.000000e+00 : f32
    %202 = vector.broadcast %cst_64 : f32 to vector<8x64xf32>
    %203 = arith.addf %202, %201 : vector<8x64xf32>
    %204 = arith.mulf %193, %203 : vector<8x64xf32>
    %205 = arith.truncf %204 : vector<8x64xf32> to vector<8x64xbf16>
    %c0_65 = arith.constant 0 : index
    %c0_66 = arith.constant 0 : index
    %206 = vector.load %arg11[%c0_65, %c0_66] : memref<64x32xbf16, #tpu.memory_space<vmem>>, vector<64x32xbf16>
    %cst_67 = arith.constant dense<0.000000e+00> : vector<8x32xf32>
    %207 = tpu.matmul %205, %206, %cst_67 {dimension_numbers = #tpu.dot_dimension_numbers<[1], [0], [0], [1], [0, 0, 1, 1], [], []>} : vector<8x64xbf16>, vector<64x32xbf16>, vector<8x32xf32> -> vector<8x32xf32>
    %c0_68 = arith.constant 0 : index
    %c0_69 = arith.constant 0 : index
    %208 = vector.load %arg12[%c0_68, %c0_69] : memref<1x32xf32, #tpu.memory_space<vmem>>, vector<1x32xf32>
    %209 = vector.broadcast %208 : vector<1x32xf32> to vector<8x32xf32>
    %210 = arith.addf %207, %209 : vector<8x32xf32>
    %211 = arith.addf %161, %210 : vector<8x32xf32>
    %c0_70 = arith.constant 0 : index
    %c0_71 = arith.constant 0 : index
    %c0_72 = arith.constant 0 : index
    %212 = vector.load %arg13[%c0_70, %c0_71, %c0_72] : memref<1x8x32xf32, #tpu.memory_space<vmem>>, vector<1x8x32xf32>
    %213 = vector.shape_cast %212 : vector<1x8x32xf32> to vector<8x32xf32>
    %214 = vector.shape_cast %211 : vector<8x32xf32> to vector<1x8x32xf32>
    tpu.vector_store %arg13[%c0_70, %c0_71, %c0_72], %214 {strides = array<i32>} : memref<1x8x32xf32, #tpu.memory_space<vmem>>, vector<1x8x32xf32>,
    return
  }
  func.func @transform_0(%arg0: i32) -> (i32, i32, i32) {
    %c0_i32 = arith.constant 0 : i32
    %c0_i32_0 = arith.constant 0 : i32
    %c0_i32_1 = arith.constant 0 : i32
    return %arg0, %c0_i32, %c0_i32_0 : i32, i32, i32
  }
  func.func @transform_1(%arg0: i32) -> (i32, i32) {
    %c0_i32 = arith.constant 0 : i32
    %c0_i32_0 = arith.constant 0 : i32
    %c0_i32_1 = arith.constant 0 : i32
    return %c0_i32, %c0_i32_0 : i32, i32
  }
  func.func @transform_2(%arg0: i32) -> (i32, i32) {
    %c0_i32 = arith.constant 0 : i32
    %c0_i32_0 = arith.constant 0 : i32
    %c0_i32_1 = arith.constant 0 : i32
    return %c0_i32, %c0_i32_0 : i32, i32
  }
  func.func @transform_3(%arg0: i32) -> (i32, i32) {
    %c0_i32 = arith.constant 0 : i32
    %c0_i32_0 = arith.constant 0 : i32
    %c0_i32_1 = arith.constant 0 : i32
    return %c0_i32, %c0_i32_0 : i32, i32
  }
  func.func @transform_4(%arg0: i32) -> (i32, i32) {
    %c0_i32 = arith.constant 0 : i32
    %c0_i32_0 = arith.constant 0 : i32
    %c0_i32_1 = arith.constant 0 : i32
    return %c0_i32, %c0_i32_0 : i32, i32
  }
  func.func @transform_5(%arg0: i32) -> (i32, i32) {
    %c0_i32 = arith.constant 0 : i32
    %c0_i32_0 = arith.constant 0 : i32
    %c0_i32_1 = arith.constant 0 : i32
    return %c0_i32, %c0_i32_0 : i32, i32
  }
  func.func @transform_6(%arg0: i32) -> (i32, i32) {
    %c0_i32 = arith.constant 0 : i32
    %c0_i32_0 = arith.constant 0 : i32
    %c0_i32_1 = arith.constant 0 : i32
    return %c0_i32, %c0_i32_0 : i32, i32
  }
  func.func @transform_7(%arg0: i32) -> (i32, i32) {
    %c0_i32 = arith.constant 0 : i32
    %c0_i32_0 = arith.constant 0 : i32
    %c0_i32_1 = arith.constant 0 : i32
    return %c0_i32, %c0_i32_0 : i32, i32
  }
  func.func @transform_8(%arg0: i32) -> (i32, i32) {
    %c0_i32 = arith.constant 0 : i32
    %c0_i32_0 = arith.constant 0 : i32
    %c0_i32_1 = arith.constant 0 : i32
    return %c0_i32, %c0_i32_0 : i32, i32
  }
  func.func @transform_9(%arg0: i32) -> (i32, i32) {
    %c0_i32 = arith.constant 0 : i32
    %c0_i32_0 = arith.constant 0 : i32
    %c0_i32_1 = arith.constant 0 : i32
    return %c0_i32, %c0_i32_0 : i32, i32
  }
  func.func @transform_10(%arg0: i32) -> (i32, i32) {
    %c0_i32 = arith.constant 0 : i32
    %c0_i32_0 = arith.constant 0 : i32
    %c0_i32_1 = arith.constant 0 : i32
    return %c0_i32, %c0_i32_0 : i32, i32
  }
  func.func @transform_11(%arg0: i32) -> (i32, i32) {
    %c0_i32 = arith.constant 0 : i32
    %c0_i32_0 = arith.constant 0 : i32
    %c0_i32_1 = arith.constant 0 : i32
    return %c0_i32, %c0_i32_0 : i32, i32
  }
  func.func @transform_12(%arg0: i32) -> (i32, i32, i32) {
    %c0_i32 = arith.constant 0 : i32
    %c0_i32_0 = arith.constant 0 : i32
    %c0_i32_1 = arith.constant 0 : i32
    return %arg0, %c0_i32, %c0_i32_0 : i32, i32, i32
  }
}

</mosaic_0001>

<bundles_post_ra>
// kernel: transformer_block_pallas.2
= control target key start
LH: loop header
LB: loop body
LE: loop exit
PB: predicated region body
PF: predicated region fallthrough
CT: control target
= control target key end

     0   :  { %s1605_s21 = smov 0   ;;  %s1779_s0 = inlined_call_operand.vmem [shape: f32[2,8,32], index: 0, kind: input, shape index: {}, may-alias: {0,12}]   ;;  %s1780_s1 = inlined_call_operand.vmem [shape: f32[1,32], index: 1, kind: input, shape index: {}]   ;;  %s1781_s2 = inlined_call_operand.vmem [shape: f32[1,32], index: 2, kind: input, shape index: {}]   ;;  %s1782_s3 = inlined_call_operand.vmem [shape: bf16[32,96], index: 3, kind: input, shape index: {}]   ;;  %s1783_s4 = inlined_call_operand.vmem [shape: bf16[32,32], index: 4, kind: input, shape index: {}]   ;;  %s1784_s5 = inlined_call_operand.vmem [shape: f32[1,32], index: 5, kind: input, shape index: {}]   ;;  %s1785_s6 = inlined_call_operand.vmem [shape: f32[1,32], index: 6, kind: input, shape index: {}]   ;;  %s1786_s7 = inlined_call_operand.vmem [shape: f32[1,32], index: 7, kind: input, shape index: {}]   ;;  %s1787_s8 = inlined_call_operand.vmem [shape: bf16[32,64], index: 8, kind: input, shape index: {}]   ;;  %s1788_s9 = inlined_call_operand.vmem [shape: f32[1,64], index: 9, kind: input, shape index: {}]   ;;  %s1789_s10 = inlined_call_operand.vmem [shape: bf16[64,32], index: 10, kind: input, shape index: {}]   ;;  %s1790_s11 = inlined_call_operand.vmem [shape: f32[1,32], index: 11, kind: input, shape index: {}]   ;;  %s1791_s12 = inlined_call_operand.vmem [shape: f32[2,8,32], index: 12, kind: output, shape index: {}, may-alias: {0,12}]  }
   0x1 LB: > { %s1300_s22 = sadd.s32 4294967295, %s1522_s21   ;;  %p1304_p0 = scmp.ge.s32.totalorder %s1522_s21, 1  ;;  %s1522_s21 = sphi %s1605_s21, %s22_s21  }
   0x2   : > { %p361_p1 = scmp.lt.s32.totalorder %s1522_s21, 3 }
   0x4   : > { %p362_p2 = pnand %p1304_p0, %p361_p1 }
   0x5   : > { %p401_p3 = scmp.lt.s32.totalorder (!%p362_p2), %s1300_s22, 1  ;;  %vm413_vm0 = vcmask (!%p362_p2), 261120   ;;  %v1476_v7 = vld [vmem:[%s1782_s3] sm:$0xff] (!%p362_p2)   ;;  %v1524_v8 = vmov (!%p362_p2), 0.0   ;;  %vm1525_vm1 = vmmov (!%p362_p2), 0   ;;  %v1477_v9 = vld [vmem:[%s1782_s3 + $0x8] sm:$0xff] (!%p362_p2)  }
   0x6   : > { %365 = sbr.rel (%p362_p2) target bundleno = 2425 (0x979), region = 68  ;;  %1368 = vmatprep.subr.bf16.mxu0 (!%p362_p2), %v1524_v8  ;;  %1372 = vmatprep.mubr.msk.bf16.mxu0 (!%p362_p2), %vm1525_vm1, %v1524_v8  ;;  %v1307_v14 = vld [vmem:[%s1780_s1] ss:$0 sm:$0xff] (!%p362_p2)  ;;  %s1526_s17 = smov (!%p362_p2), 96   ;;  %vm508_vm2 = vcmask (!%p362_p2), 64512   ;;  %vm575_vm3 = vcmask (!%p362_p2), 1043456  }
   0x7   : > { %1369 = vmatpush3.bf16.msra.mxu0 (!%p362_p2), %v1476_v7  ;;  %1376 = vmatprep.subr.bf16.mxu1 (!%p362_p2), %v1524_v8  ;;  %v1308_v16 = vld [vmem:[%s1781_s2] ss:$0 sm:$0xff] (!%p362_p2)  ;;  %s1527_s18 = smov (!%p362_p2), 120   ;;  %s1528_s19 = smov (!%p362_p2), 88   ;;  %vm984_vm4 = vcmask (!%p362_p2), 130048   ;;  %vm986_vm5 = vcmask (!%p362_p2), 195584  }
   0x8   : > { %1370 = vmatprep.subr.bf16.mxu0 (!%p362_p2), %v1524_v8  ;;  %1378 = vmatprep.mubr.msk.bf16.mxu1 (!%p362_p2), %vm1525_vm1, %v1524_v8  ;;  %s1529_s20 = smov (!%p362_p2), 80   ;;  %s1530_s24 = smov (!%p362_p2), 112   ;;  %vm1201_vm6 = vcmask (!%p362_p2), 523264  }
   0x9   : > { %s1531_s25 = smov (!%p362_p2), 72   ;;  %s1533_s27 = smov (!%p362_p2), 64  }
   0xa   : > { %s1534_s28 = smov (!%p362_p2), 56   ;;  %s1535_s29 = smov (!%p362_p2), 48  }
   0xb   : > { %1371 = vmatpush3.bf16.msra.mxu0 (!%p362_p2), %v1477_v9  ;;  %s1536_s30 = smov (!%p362_p2), 40   ;;  %s1537_s13 = smov (!%p362_p2), 8  }
   0xc   : > { %1382 = vmatprep.subr.bf16.mxu0 (!%p362_p2), %v1524_v8 }
   0xd   : > { %s1793_s22 = smov (!%p401_p3, %s1300_s22), 1 }
   0xe   : > { %s1305_s23 = sshll.u32 %s1793_s22, 3 }
   0xf   : > { %s404_s26 = scalar_lea.vmem %s1779_s0, %s1305_s23  ;;  %s408_s14 = scalar_lea.vmem %s1791_s12, %s1305_s23 }
  0x10   : > { %v1621_v0 = vld [vmem:[%s404_s26] sm:$0xff]  ;;  %s1532_s26 = smov 104  }
  0x11   : > { %v414_v1 = vsel %vm413_vm0, %v1621_v0, 0.0 }
  0x12   : > { %415 = vadd.xlane.f32.xlu0 %v414_v1 }
  0x9f   : > { %v416_v2 = vpop.xlane.xlu0 %415 }
  0xa0   : > { %v418_v3 = vmul.f32 0.03125, %v416_v2 }
  0xa2   : > { %v419_v4 = vsub.f32 %v1621_v0, %v418_v3 }
  0xa4   : > { %v420_v5 = vmul.f32 %v419_v4, %v419_v4 }
  0xa6   : > { %v421_v6 = vsel %vm413_vm0, %v420_v5, 0.0 }
  0xa7   : > { %422 = vadd.xlane.f32.xlu0 %v421_v6 }
 0x134   : > { %v423_v10 = vpop.xlane.xlu0 %422 }
 0x135   : > { %v424_v11 = vmul.f32 0.03125, %v423_v10 }
 0x137   : > { %v425_v12 = vadd.f32 1e-05, %v424_v11 }
 0x139   : > { %1486 = vrsqrt.f32 %v425_v12 }
 0x143   : > { %v1487_v13 = vpop.eup %1486 }
 0x144   : > { %v427_v15 = vmul.f32 %v1487_v13, %v419_v4 }
 0x146   : > { %v434_v17 = vmul.f32 %v1307_v14, %v427_v15 }
 0x148   : > { %v441_v18 = vadd.f32 %v1308_v16, %v434_v17 }
 0x14a   : > { %v442_v19 = vpack.c.bf16 %v441_v18, %v441_v18 }
 0x14c   : > { %1373 = vmatmul.mubr.msk.bf16.vlgmr.msra.gmra.mrb[0].mxu0 %vm413_vm0, %v442_v19 }
 0x14d   : > { %1384 = vmatprep.mubr.msk.bf16.mxu0 %vm1525_vm1, %v1524_v8 }
 0x21f   : > { %v496_v20 = vpop.f32.mrb[0].mxu0 }
 0x220   : > { %v502_v21 = vmul.f32 0.35355338, %v496_v20  ;;  %v1650_v22 = vpack.c.bf16 %v496_v20, %v496_v20  ;;  %v1374_v23 = vpop.f32.mrb[1].mxu0 }
 0x221   : > { %v499_v24 = vpop.f32.mrb[2].mxu0 }
 0x222   : > { %v503_v25 = vpack.c.bf16 %v502_v21, %v502_v21  ;;  %506 = vrot.lane.b32.xlu1 %v1650_v22, %s1526_s17  ;;  %v1375_v26 = vpop.f32.mrb[3].mxu0 }
 0x224   : > { %623 = vrot.lane.b32.xlu0 %v503_v25, %s1527_s18  ;;  %s1538_s18 = smov 16  }
 0x226   : > { %625 = vrot.lane.b32.xlu1 %v1650_v22, %s1528_s19  ;;  %s1539_s19 = smov 24  }
 0x22a   : > { %741 = vrot.lane.b32.xlu1 %v1650_v22, %s1529_s20 }
 0x22e   : > { %739 = vrot.lane.b32.xlu1 %v503_v25, %s1530_s24 }
 0x232   : > { %857 = vrot.lane.b32.xlu1 %v1650_v22, %s1531_s25 }
 0x236   : > { %855 = vrot.lane.b32.xlu1 %v503_v25, %s1532_s26 }
 0x294   : > { %v507_v27 = vpop.permute.xlu1 %506 }
 0x295   : > { %v513_v28 = vsel %vm508_vm2, %v507_v27, 0 }
 0x296   : > { %1377 = vmatpush3.bf16.xpose.msra.mxu1 %v513_v28  ;;  %v624_v32 = vpop.permute.xlu0 %623 }
 0x297   : > { %1388 = vmatprep.subr.bf16.mxu1 %v1524_v8 }
 0x298   : > { %v626_v29 = vpop.permute.xlu1 %625 }
 0x299   : > { %v631_v30 = vsel %vm508_vm2, %v626_v29, 0 }
 0x29c   : > { %v742_v31 = vpop.permute.xlu1 %741 }
 0x29d   : > { %1379 = vmatmul.mubr.msk.bf16.vlgmr.msra.gmra.mrb[0].mxu1 %vm508_vm2, %v503_v25  ;;  %v747_v34 = vsel %vm508_vm2, %v742_v31, 0 }
 0x29e   : > { %1389 = vmatpush3.bf16.xpose.msra.mxu1 %v631_v30  ;;  %1390 = vmatprep.mubr.msk.bf16.mxu1 %vm1525_vm1, %v1524_v8 }
 0x29f   : > { %1400 = vmatprep.subr.bf16.mxu1 %v1524_v8 }
 0x2a0   : > { %v740_v33 = vpop.permute.xlu1 %739 }
 0x2a4   : > { %v858_v35 = vpop.permute.xlu1 %857 }
 0x2a5   : > { %1391 = vmatmul.mubr.msk.bf16.vlgmr.msra.gmra.mrb[4].mxu1 %vm508_vm2, %v624_v32  ;;  %v863_v36 = vsel %vm508_vm2, %v858_v35, 0 }
 0x2a6   : > { %1401 = vmatpush3.bf16.xpose.msra.mxu1 %v747_v34  ;;  %1402 = vmatprep.mubr.msk.bf16.mxu1 %vm1525_vm1, %v1524_v8 }
 0x2a7   : > { %1412 = vmatprep.subr.bf16.mxu1 %v1524_v8 }
 0x2a8   : > { %v856_v37 = vpop.permute.xlu1 %855 }
 0x2ad   : > { %1403 = vmatmul.mubr.msk.bf16.vlgmr.msra.gmra.mrb[8].mxu1 %vm508_vm2, %v740_v33 }
 0x2ae   : > { %1413 = vmatpush3.bf16.xpose.msra.mxu1 %v863_v36  ;;  %1414 = vmatprep.mubr.msk.bf16.mxu1 %vm1525_vm1, %v1524_v8 }
 0x2af   : > { %1424 = vmatprep.subr.bf16.mxu1 %v1524_v8 }
 0x2b5   : > { %1415 = vmatmul.mubr.msk.bf16.vlgmr.msra.gmra.mrb[12].mxu1 %vm508_vm2, %v856_v37 }
 0x2b6   : > { %1428 = vmatprep.mubr.msk.bf16.mxu1 %vm1525_vm1, %v1524_v8 }
 0x370   : > { %v549_v38 = vpop.f32.mrb[0].mxu1 }
 0x371   : > { %v1380_v39 = vpop.f32.mrb[1].mxu1  ;;  %v555_v40 = vsel %vm508_vm2, %v549_v38, -inf }
 0x372   : > { %556 = vmax.xlane.f32.xlu1 %v555_v40  ;;  %v552_v41 = vpop.f32.mrb[2].mxu1 }
 0x373   : > { %v1381_v42 = vpop.f32.mrb[3].mxu1 }
 0x378   : > { %v667_v43 = vpop.f32.mrb[4].mxu1 }
 0x379   : > { %v1392_v44 = vpop.f32.mrb[5].mxu1  ;;  %v673_v45 = vsel %vm508_vm2, %v667_v43, -inf }
 0x37a   : > { %674 = vmax.xlane.f32.xlu0 %v673_v45  ;;  %v670_v46 = vpop.f32.mrb[6].mxu1 }
 0x37b   : > { %v1393_v47 = vpop.f32.mrb[7].mxu1 }
 0x380   : > { %v783_v48 = vpop.f32.mrb[8].mxu1 }
 0x381   : > { %v1404_v49 = vpop.f32.mrb[9].mxu1  ;;  %v789_v57 = vsel %vm508_vm2, %v783_v48, -inf }
 0x382   : > { %v786_v50 = vpop.f32.mrb[10].mxu1 }
 0x383   : > { %570 = vrot.lane.b32.xlu1 %v1650_v22, %s1533_s27  ;;  %v1405_v51 = vpop.f32.mrb[11].mxu1 }
 0x388   : > { %v899_v52 = vpop.f32.mrb[12].mxu1 }
 0x389   : > { %v1416_v53 = vpop.f32.mrb[13].mxu1  ;;  %v905_v54 = vsel %vm508_vm2, %v899_v52, -inf }
 0x38a   : > { %906 = vmax.xlane.f32.xlu0 %v905_v54  ;;  %v902_v55 = vpop.f32.mrb[14].mxu1 }
 0x38b   : > { %v1417_v56 = vpop.f32.mrb[15].mxu1 }
 0x3a0   : > { %688 = vrot.lane.b32.xlu0 %v1650_v22, %s1534_s28 }
 0x3a7   : > { %790 = vmax.xlane.f32.xlu1 %v789_v57 }
 0x3b8   : > { %804 = vrot.lane.b32.xlu1 %v1650_v22, %s1535_s29 }
 0x3bc   : > { %920 = vrot.lane.b32.xlu1 %v1650_v22, %s1536_s30 }
 0x3ff   : > { %v557_v58 = vpop.xlane.xlu1 %556 }
 0x400   : > { %v561_v59 = vsub.f32 %v549_v38, %v557_v58  ;;  %v558_v28 = vsub.f32 -inf, %v557_v58 }
 0x402   : > { %v562_v60 = vmul.f32 1.442695, %v561_v59  ;;  %v559_v29 = vmul.f32 1.442695, %v558_v28 }
 0x403   : > { %v571_v61 = vpop.permute.xlu1 %570 }
 0x404   : > { %v577_v62 = vsel %vm575_vm3, %v571_v61, 0  ;;  %1488 = vpow2.f32 %v562_v60 }
 0x405   : > { %1383 = vmatpush3.bf16.msra.mxu0 %v577_v62 }
 0x406   : > { %1394 = vmatprep.subr.bf16.mxu0 %v1524_v8 }
 0x407   : > { %v675_v63 = vpop.xlane.xlu0 %674 }
 0x408   : > { %v679_v1 = vsub.f32 %v667_v43, %v675_v63  ;;  %v676_v31 = vsub.f32 -inf, %v675_v63 }
 0x40a   : > { %v680_v2 = vmul.f32 1.442695, %v679_v1  ;;  %v677_v34 = vmul.f32 1.442695, %v676_v31  ;;  %v1478_v1 = vld [vmem:[%s1783_s4] sm:$0xff]  }
 0x40b   : > { %1425 = vmatpush3.bf16.msra.mxu1 %v1478_v1 }
 0x40c   : > { %1490 = vpow2.f32 %v680_v2  ;;  %1426 = vmatprep.subr.bf16.mxu1 %v1524_v8 }
 0x40e   : > { %v1489_v3 = vpop.eup %1488 }
 0x40f   : > { %v569_v4 = vpack.c.bf16 %v1489_v3, %v1489_v3  ;;  %v565_v16 = vsel %vm508_vm2, %v1489_v3, 0.0  ;;  %v1479_v3 = vld [vmem:[%s1783_s4 + $0x8] sm:$0xff]  }
 0x410   : > { %1427 = vmatpush3.bf16.msra.mxu1 %v1479_v3 }
 0x411   : > { %1385 = vmatmul.mubr.msk.bf16.vlgmr.msra.gmra.mrb[4].mxu0 %vm508_vm2, %v569_v4  ;;  %1440 = vmatprep.subr.bf16.mxu1 %v1524_v8 }
 0x412   : > { %1396 = vmatprep.mubr.msk.bf16.mxu0 %vm1525_vm1, %v1524_v8 }
 0x416   : > { %v1491_v5 = vpop.eup %1490 }
 0x417   : > { %v1689_v6 = vpop.xlane.xlu0 %906  ;;  %v683_v9 = vsel %vm508_vm2, %v1491_v5, 0.0  ;;  %v687_v13 = vpack.c.bf16 %v1491_v5, %v1491_v5 }
 0x418   : > { %v911_v7 = vsub.f32 %v899_v52, %v1689_v6  ;;  %684 = vadd.xlane.f32.xlu0 %v683_v9  ;;  %v908_v57 = vsub.f32 -inf, %v1689_v6 }
 0x41a   : > { %v912_v10 = vmul.f32 1.442695, %v911_v7  ;;  %v909_v58 = vmul.f32 1.442695, %v908_v57 }
 0x41b   : > { %v689_v11 = vpop.permute.xlu0 %688 }
 0x41c   : > { %v694_v12 = vsel %vm575_vm3, %v689_v11, 0  ;;  %1492 = vpow2.f32 %v912_v10 }
 0x41d   : > { %1395 = vmatpush3.bf16.msra.mxu0 %v694_v12 }
 0x41e   : > { %1406 = vmatprep.subr.bf16.mxu0 %v1524_v8 }
 0x420   : > { %1397 = vmatmul.mubr.msk.bf16.vlgmr.msra.gmra.mrb[8].mxu0 %vm508_vm2, %v687_v13 }
 0x421   : > { %1408 = vmatprep.mubr.msk.bf16.mxu0 %vm1525_vm1, %v1524_v8 }
 0x426   : > { %v1493_v14 = vpop.eup %1492 }
 0x427   : > { %v915_v15 = vsel %vm508_vm2, %v1493_v14, 0.0  ;;  %v919_v27 = vpack.c.bf16 %v1493_v14, %v1493_v14 }
 0x428   : > { %916 = vadd.xlane.f32.xlu0 %v915_v15 }
 0x42c   : > { %566 = vadd.xlane.f32.xlu0 %v565_v16 }
 0x434   : > { %v791_v17 = vpop.xlane.xlu1 %790 }
 0x435   : > { %v795_v18 = vsub.f32 %v783_v48, %v791_v17  ;;  %v792_v55 = vsub.f32 -inf, %v791_v17 }
 0x437   : > { %v796_v19 = vmul.f32 1.442695, %v795_v18  ;;  %v793_v56 = vmul.f32 1.442695, %v792_v55  ;;  %v1326_v55 = vld [vmem:[%s1788_s9] ss:$0 sm:$0xff] }
 0x438   : > { %v805_v20 = vpop.permute.xlu1 %804 }
 0x439   : > { %v810_v21 = vsel %vm575_vm3, %v805_v20, 0  ;;  %1494 = vpow2.f32 %v796_v19 }
 0x43a   : > { %1407 = vmatpush3.bf16.msra.mxu0 %v810_v21  ;;  %1496 = vpow2.f32 %v559_v29 }
 0x43b   : > { %1418 = vmatprep.subr.bf16.mxu0 %v1524_v8  ;;  %1498 = vpow2.f32 %v677_v34 }
 0x43c   : > { %v921_v23 = vpop.permute.xlu1 %920 }
 0x43d   : > { %v926_v26 = vsel %vm575_vm3, %v921_v23, 0 }
 0x443   : > { %v1495_v22 = vpop.eup %1494 }
 0x444   : > { %v799_v24 = vsel %vm508_vm2, %v1495_v22, 0.0  ;;  %v803_v25 = vpack.c.bf16 %v1495_v22, %v1495_v22  ;;  %v1497_v33 = vpop.eup %1496 }
 0x445   : > { %800 = vadd.xlane.f32.xlu1 %v799_v24  ;;  %v564_v36 = vmul.f32 0.0, %v1497_v33  ;;  %v1499_v38 = vpop.eup %1498 }
 0x446   : > { %1409 = vmatmul.mubr.msk.bf16.vlgmr.msra.gmra.mrb[12].mxu0 %vm508_vm2, %v803_v25  ;;  %v682_v39 = vmul.f32 0.0, %v1499_v38 }
 0x447   : > { %1419 = vmatpush3.bf16.msra.mxu0 %v926_v26  ;;  %1420 = vmatprep.mubr.msk.bf16.mxu0 %vm1525_vm1, %v1524_v8 }
 0x448   : > { %1432 = vmatprep.subr.bf16.mxu0 %v1524_v8 }
 0x44e   : > { %1421 = vmatmul.mubr.msk.bf16.vlgmr.msra.gmra.mrb[16].mxu0 %vm508_vm2, %v919_v27  ;;  %v1320_v27 = vld [vmem:[%s1784_s5] ss:$0 sm:$0xff] }
 0x44f   : > { %1436 = vmatprep.mubr.msk.bf16.mxu0 %vm1525_vm1, %v1524_v8 }
 0x4a5   : > { %v685_v30 = vpop.xlane.xlu0 %684 }
 0x4a6   : > { %v686_v44 = vadd.f32 %v685_v30, %v682_v39 }
 0x4b5   : > { %v917_v32 = vpop.xlane.xlu0 %916 }
 0x4b9   : > { %v567_v35 = vpop.xlane.xlu0 %566 }
 0x4ba   : > { %v568_v37 = vadd.f32 %v567_v35, %v564_v36 }
 0x4bc   : > { %1500 = vrcp.f32 %v568_v37 }
 0x4bd   : > { %1502 = vrcp.f32 %v686_v44 }
 0x4be   : > { %1504 = vpow2.f32 %v793_v56 }
 0x4bf   : > { %1506 = vpow2.f32 %v909_v58 }
 0x4c6   : > { %v1501_v43 = vpop.eup %1500 }
 0x4c7   : > { %v1503_v51 = vpop.eup %1502 }
 0x4c8   : > { %v1505_v59 = vpop.eup %1504 }
 0x4c9   : > { %v798_v61 = vmul.f32 0.0, %v1505_v59  ;;  %v1507_v63 = vpop.eup %1506 }
 0x4ca   : > { %v914_v2 = vmul.f32 0.0, %v1507_v63 }
 0x4cc   : > { %v918_v4 = vadd.f32 %v917_v32, %v914_v2 }
 0x4d2   : > { %v801_v60 = vpop.xlane.xlu1 %800 }
 0x4d3   : > { %v802_v62 = vadd.f32 %v801_v60, %v798_v61 }
 0x4d5   : > { %1508 = vrcp.f32 %v802_v62 }
 0x4d6   : > { %1510 = vrcp.f32 %v918_v4 }
 0x4df   : > { %v1509_v9 = vpop.eup %1508 }
 0x4e0   : > { %v1511_v16 = vpop.eup %1510 }
 0x4e4   : > { %v613_v40 = vpop.f32.mrb[4].mxu0 }
 0x4e5   : > { %v619_v41 = vadd.f32 %v613_v40, %v564_v36  ;;  %v1386_v42 = vpop.f32.mrb[5].mxu0  ;;  %v1480_v40 = vld [vmem:[%s1787_s8] sm:$0xff]  }
 0x4e6   : > { %v616_v45 = vpop.f32.mrb[6].mxu0  ;;  %1433 = vmatpush3.bf16.msra.mxu0 %v1480_v40 }
 0x4e7   : > { %v621_v46 = vmul.f32 %v1501_v43, %v619_v41  ;;  %v1387_v47 = vpop.f32.mrb[7].mxu0  ;;  %1434 = vmatprep.subr.bf16.mxu0 %v1524_v8  ;;  %v1324_v45 = vld [vmem:[%s1785_s6] ss:$0 sm:$0xff] }
 0x4e8   : > { %v1325_v47 = vld [vmem:[%s1786_s7] ss:$0 sm:$0xff] }
 0x4f3   : > { %v730_v48 = vpop.f32.mrb[8].mxu0 }
 0x4f4   : > { %v736_v49 = vadd.f32 %v730_v48, %v682_v39  ;;  %v1398_v50 = vpop.f32.mrb[9].mxu0 }
 0x4f5   : > { %v733_v52 = vpop.f32.mrb[10].mxu0 }
 0x4f6   : > { %v738_v53 = vmul.f32 %v1503_v51, %v736_v49  ;;  %v1399_v54 = vpop.f32.mrb[11].mxu0  ;;  %v1482_v51 = vld [vmem:[%s1789_s10] sm:$0xff]   ;;  %v1483_v52 = vld [vmem:[%s1789_s10 + $0x8] sm:$0xff]  }
 0x4f7   : > { %v1485_v54 = vld [vmem:[%s1789_s10 + $0x18] sm:$0xff]  }
 0x4f8   : > { %972 = vrot.lane.b32.xlu1 %v738_v53, %s1537_s13  ;;  %v1484_v53 = vld [vmem:[%s1789_s10 + $0x10] sm:$0xff]  }
 0x519   : > { %v846_v5 = vpop.f32.mrb[12].mxu0 }
 0x51a   : > { %v852_v6 = vadd.f32 %v846_v5, %v798_v61  ;;  %v1410_v7 = vpop.f32.mrb[13].mxu0 }
 0x51b   : > { %v849_v10 = vpop.f32.mrb[14].mxu0  ;;  %v1330_v7 = vld [vmem:[%s1790_s11] ss:$0 sm:$0xff] }
 0x51c   : > { %v854_v11 = vmul.f32 %v1509_v9, %v852_v6  ;;  %v1411_v12 = vpop.f32.mrb[15].mxu0 }
 0x51e   : > { %976 = vrot.lane.b32.xlu0 %v854_v11, %s1538_s18 }
 0x521   : > { %v962_v13 = vpop.f32.mrb[16].mxu0 }
 0x522   : > { %v968_v14 = vadd.f32 %v962_v13, %v914_v2  ;;  %v1422_v15 = vpop.f32.mrb[17].mxu0 }
 0x523   : > { %v965_v17 = vpop.f32.mrb[18].mxu0 }
 0x524   : > { %v970_v18 = vmul.f32 %v1511_v16, %v968_v14  ;;  %v1423_v19 = vpop.f32.mrb[19].mxu0 }
 0x526   : > { %980 = vrot.lane.b32.xlu1 %v970_v18, %s1539_s19 }
 0x56a   : > { %v973_v20 = vpop.permute.xlu1 %972 }
 0x56b   : > { %v983_v22 = vsel %vm508_vm2, %v621_v46, %v973_v20 }
 0x590   : > { %v977_v21 = vpop.permute.xlu0 %976 }
 0x591   : > { %v985_v23 = vsel %vm984_vm4, %v983_v22, %v977_v21 }
 0x598   : > { %v981_v24 = vpop.permute.xlu1 %980 }
 0x599   : > { %v987_v25 = vsel %vm986_vm5, %v985_v23, %v981_v24 }
 0x59a   : > { %v988_v26 = vpack.c.bf16 %v987_v25, %v987_v25 }
 0x59c   : > { %1429 = vmatmul.mubr.msk.bf16.vlgmr.msra.gmra.mrb[16].mxu1 %vm413_vm0, %v988_v26 }
 0x59d   : > { %1448 = vmatprep.mubr.msk.bf16.mxu1 %vm1525_vm1, %v1524_v8  ;;  %1441 = vmatpush3.bf16.msra.mxu1 %v1482_v51 }
 0x59e   : > { %1442 = vmatprep.subr.bf16.mxu1 %v1524_v8 }
 0x5a1   : > { %1443 = vmatpush3.bf16.msra.mxu1 %v1483_v52 }
 0x5a2   : > { %1444 = vmatprep.subr.bf16.mxu1 %v1524_v8 }
 0x5a5   : > { %1445 = vmatpush3.bf16.msra.mxu1 %v1484_v53 }
 0x5a6   : > { %1446 = vmatprep.subr.bf16.mxu1 %v1524_v8 }
 0x5a9   : > { %1447 = vmatpush3.bf16.msra.mxu1 %v1485_v54 }
 0x66f   : > { %v1049_v28 = vpop.f32.mrb[16].mxu1 }
 0x670   : > { %v1050_v29 = vadd.f32 %v1320_v27, %v1049_v28  ;;  %v1430_v30 = vpop.f32.mrb[17].mxu1 }
 0x671   : > { %v1052_v31 = vpop.f32.mrb[18].mxu1 }
 0x672   : > { %v1728_v32 = vadd.f32 %v1050_v29, %v1621_v0  ;;  %v1431_v33 = vpop.f32.mrb[19].mxu1  ;;  %v1481_v0 = vld [vmem:[%s1787_s8 + $0x8] sm:$0xff]  }
 0x673   : > { %1435 = vmatpush3.bf16.msra.mxu0 %v1481_v0 }
 0x674   : > { %v1058_v34 = vsel %vm413_vm0, %v1728_v32, 0.0 }
 0x675   : > { %1059 = vadd.xlane.f32.xlu1 %v1058_v34 }
 0x702   : > { %v1060_v35 = vpop.xlane.xlu1 %1059 }
 0x703   : > { %v1061_v36 = vmul.f32 0.03125, %v1060_v35 }
 0x705   : > { %v1062_v37 = vsub.f32 %v1728_v32, %v1061_v36 }
 0x707   : > { %v1063_v38 = vmul.f32 %v1062_v37, %v1062_v37 }
 0x709   : > { %v1064_v39 = vsel %vm413_vm0, %v1063_v38, 0.0 }
 0x70a   : > { %1065 = vadd.xlane.f32.xlu0 %v1064_v39 }
 0x797   : > { %v1066_v41 = vpop.xlane.xlu0 %1065 }
 0x798   : > { %v1067_v42 = vmul.f32 0.03125, %v1066_v41 }
 0x79a   : > { %v1068_v43 = vadd.f32 1e-05, %v1067_v42 }
 0x79c   : > { %1512 = vrsqrt.f32 %v1068_v43 }
 0x7a6   : > { %v1513_v44 = vpop.eup %1512 }
 0x7a7   : > { %v1070_v46 = vmul.f32 %v1513_v44, %v1062_v37 }
 0x7a9   : > { %v1077_v48 = vmul.f32 %v1324_v45, %v1070_v46 }
 0x7ab   : > { %v1084_v49 = vadd.f32 %v1325_v47, %v1077_v48 }
 0x7ad   : > { %v1085_v50 = vpack.c.bf16 %v1084_v49, %v1084_v49 }
 0x7af   : > { %1437 = vmatmul.mubr.msk.bf16.vlgmr.msra.gmra.mrb[20].mxu0 %vm413_vm0, %v1085_v50 }
 0x882   : > { %v1146_v56 = vpop.f32.mrb[20].mxu0 }
 0x883   : > { %v1147_v57 = vadd.f32 %v1326_v55, %v1146_v56  ;;  %v1438_v58 = vpop.f32.mrb[21].mxu0 }
 0x884   : > { %v1149_v59 = vpop.f32.mrb[22].mxu0 }
 0x885   : > { %v1153_v60 = vmul.f32 0.044715, %v1147_v57  ;;  %v1439_v61 = vpop.f32.mrb[23].mxu0  ;;  %v1152_v4 = vmul.f32 0.5, %v1147_v57 }
 0x887   : > { %v1154_v62 = vmul.f32 %v1153_v60, %v1147_v57 }
 0x889   : > { %v1155_v63 = vmul.f32 %v1154_v62, %v1147_v57 }
 0x88b   : > { %v1156_v1 = vadd.f32 %v1155_v63, %v1147_v57 }
 0x88d   : > { %v1157_v2 = vmul.f32 0.7978846, %v1156_v1 }
 0x88f   : > { %1514 = vtanh.f32 %v1157_v2 }
 0x899   : > { %v1515_v3 = vpop.eup %1514 }
 0x89a   : > { %v1159_v8 = vadd.f32 1.0, %v1515_v3 }
 0x89c   : > { %v1160_v5 = vmul.f32 %v1159_v8, %v1152_v4 }
 0x89e   : > { %v1161_v6 = vpack.c.bf16 %v1160_v5, %v1160_v5 }
 0x8a0   : > { %1449 = vmatmul.mubr.msk.bf16.vlgmr.msra.gmra.mrb[20].mxu1 %vm1201_vm6, %v1161_v6 }
 0x973   : > { %v1239_v9 = vpop.f32.mrb[20].mxu1 }
 0x974   : > { %v1240_v10 = vadd.f32 %v1330_v7, %v1239_v9  ;;  %v1450_v11 = vpop.f32.mrb[21].mxu1 }
 0x975   : > { %v1242_v12 = vpop.f32.mrb[22].mxu1 }
 0x976   : > { %v1245_v13 = vadd.f32 %v1240_v10, %v1728_v32  ;;  %v1451_v14 = vpop.f32.mrb[23].mxu1 }
 0x978   : > { %1246 = vst.msk [vmem:[%s408_s14] sm:$0xff] %vm413_vm0, %v1245_v13 }
 0x979 PF: > { %s22_s21 = sadd.s32 1, %s1522_s21  }
 0x97a   : > { %p19_p4 = scmp.ge.s32.totalorder %s22_s21, 4  }
 0x97c   :  { %21 = sbr.rel (!%p19_p4) target bundleno = 1 (0x1), region = 98 }

// kernel: transformer_block_pallas.3
= control target key start
LH: loop header
LB: loop body
LE: loop exit
PB: predicated region body
PF: predicated region fallthrough
CT: control target
= control target key end

     0   :  { %17 = vsyncpa [#allocation3], 0  ;;  %s2104_s0 = inlined_call_operand.hbm [shape: f32[2,8,32], index: 0, kind: input, shape index: {}, may-alias: {0,12}]   ;;  %s2105_s1 = inlined_call_operand.vmem [shape: f32[1,32], index: 1, kind: input, shape index: {}]   ;;  %s2106_s2 = inlined_call_operand.vmem [shape: f32[1,32], index: 2, kind: input, shape index: {}]   ;;  %s2107_s3 = inlined_call_operand.vmem [shape: bf16[32,96], index: 3, kind: input, shape index: {}]   ;;  %s2108_s4 = inlined_call_operand.vmem [shape: bf16[32,32], index: 4, kind: input, shape index: {}]   ;;  %s2109_s5 = inlined_call_operand.vmem [shape: f32[1,32], index: 5, kind: input, shape index: {}]   ;;  %s2110_s6 = inlined_call_operand.vmem [shape: f32[1,32], index: 6, kind: input, shape index: {}]   ;;  %s2111_s7 = inlined_call_operand.vmem [shape: f32[1,32], index: 7, kind: input, shape index: {}]   ;;  %s2112_s8 = inlined_call_operand.vmem [shape: bf16[32,64], index: 8, kind: input, shape index: {}]   ;;  %s2113_s9 = inlined_call_operand.vmem [shape: f32[1,64], index: 9, kind: input, shape index: {}]   ;;  %s2114_s10 = inlined_call_operand.vmem [shape: bf16[64,32], index: 10, kind: input, shape index: {}]   ;;  %s2115_s11 = inlined_call_operand.vmem [shape: f32[1,32], index: 11, kind: input, shape index: {}]   ;;  %s2116_s12 = inlined_call_operand.hbm [shape: f32[2,8,32], index: 12, kind: output, shape index: {}, may-alias: {0,12}]  }
   0x1   :  { %19 = vsyncpa [#allocation3 + $0x1], 0 }
   0x2   :  { %20 = vsyncpa [#allocation4], 0 }
   0x3   :  { %22 = vsyncpa [#allocation4 + $0x1], 0  ;;  %s1789_s21 = smov 0   ;;  %s1791_s22 = smov 0  }
   0x4   :  { %s1793_s23 = smov 0   ;;  %s1795_s24 = smov 0  }
   0x5 LB: > { %2121 = sst [smem:[#allocation8_spill]] %s1700_s23  ;;  %s1810_s25 = sadd.s32 4294967295, %s1704_s24   ;;  %s1704_s24 = sphi %s1795_s24, %s2134_s24   ;;  %s1700_s23 = sphi %s1793_s23, %s2136_s23   ;;  %s1696_s22 = sphi %s1791_s22, %s2138_s22   ;;  %s1692_s21 = sphi %s1789_s21, %s2137_s21  }
   0x6   : > { %s1351_s26 = sadd.s32 4294967294, %s1704_s24   ;;  %s1814_s27 = sadd.s32 1, %s1704_s24  }
   0x7   : > { %2122 = sst [smem:[#allocation9_spill]] %s1814_s27  ;;  %s35_s28 = sadd.s32 1, %s1700_s23 }
   0x8   : > { %s32_s29 = ssub.s32 %s1704_s24, %s1814_s27  ;;  %p42_p0 = scmp.ne.s32.totalorder %s1700_s23, %s1696_s22 }
   0x9   : > { %p33_p1 = scmp.eq.s32.totalorder %s32_s29, 0  ;;  %p43_p2 = scmp.eq.s32.totalorder %s1704_s24, 0 }
   0xa   : > { %p48_p3 = scmp.ne.s32.totalorder %s1696_s22, %s1692_s21  ;;  %p49_p4 = scmp.eq.s32.totalorder %s1810_s25, 0 }
   0xb   : > { %s1826_s30 = scalar_select %p33_p1, %s1700_s23, %s35_s28  }
   0xc   : > { %p1828_p5 = por %p43_p2, %p42_p0  ;;  %p1832_p6 = por %p49_p4, %p48_p3 }
   0xd   : > { %2123 = sst [smem:[#allocation10_spill]] %s1826_s30  ;;  %p303_p7 = scmp.eq.s32.totalorder %s1810_s25, 1 }
   0xe   : > { %p309_p8 = scmp.eq.s32.totalorder %s1351_s26, 1  ;;  %p1518_p10 = scmp.lt.s32.totalorder %s1704_s24, 2 }
   0xf   : > { %p1839_p11 = por %p303_p7, %p42_p0  ;;  %s362_s17 = sand.u32 1, %s1700_s23  }
  0x10   : > { %p1843_p12 = por %p309_p8, %p48_p3  ;;  %s1355_s18 = sshll.u32 %s1704_s24, 7 }
  0x11   : > { %s2126_s15 = scalar_select %p1839_p11, 1, 0 }
  0x12   : > { %s2127_s16 = scalar_select %p1843_p12, 1, 0 }
  0x13   : > { %s1354_s19 = sshll.u32 %s362_s17, 3  ;;  %s1852_s29 = scalar_lea.hbm %s2104_s0, %s1355_s18 }
  0x14   : > { %s366_s26 = scalar_lea.vmem [#allocation2], %s1354_s19  ;;  %p1856_p13 = pnand %p1518_p10, %p1828_p5 }
  0x15   : > { %s373_s30 = sshll.u32 %s366_s26, 4  ;;  %s363_s20 = scalar_lea.sflag [#allocation3], %s362_s17  ;;  %s1860_s30 = int_to_ptr.vmem [resolvable:$true] %s373_s30 }
  0x16   : > { %s1608_s18 = scalar_lea.hbm %s1852_s29, 128  ;;  %p1610_p3 = pneg %p1856_p13 }
  0x17   : > { %p1609_p2 = scmp.ne.s32.totalorder %s1852_s29, %s1608_s18  ;;  %s1613_s28 = scalar_lea.hbm %s2104_s0, 256 }
  0x18   : > { %p1614_p5 = scmp.lt.u32.totalorder %s1852_s29, %s2104_s0  ;;  %p1615_p8 = scmp.lt.u32.totalorder %s1613_s28, %s1608_s18 }
  0x19   : > { %p1611_p4 = pnand %p1610_p3, %p1609_p2  ;;  %p1617_p9 = scmp.lt.u32.totalorder %s1608_s18, %s1852_s29 }
  0x1a   : > { %p1616_p10 = por %p1615_p8, %p1614_p5 }
  0x1b   : > { %p1612_p7 = pneg %p1611_p4 }
  0x1c   : > { %p1618_p0 = por %p1617_p9, %p1616_p10 }
  0x1e   : > { %p1619_p1 = pnand %p1618_p0, %p1612_p7 }
  0x20   : > { %1622 = shalt.err (!%p1619_p1)
}
  0x21   : > { %s1623_s17 = scalar_lea.vmem %s1860_s30, 128  ;;  %s1706_s13 = smov [#allocation2]  }
  0x22   : > { %p1624_p2 = scmp.ne.s32.totalorder %s1860_s30, %s1623_s17  ;;  %s1628_s19 = sshll.u32 %s1706_s13, 4  ;;  %s1629_s19 = int_to_ptr.vmem [resolvable:$false] %s1628_s19 }
  0x23   : > { %s1630_s23 = scalar_lea.vmem %s1629_s19, 256  ;;  %p1631_p11 = scmp.lt.s32.totalorder %s1860_s30, %s1629_s19 }
  0x24   : > { %p1626_p4 = pnand %p1624_p2, %p1610_p3  ;;  %p1632_p5 = scmp.lt.s32.totalorder %s1630_s23, %s1623_s17 }
  0x26   : > { %p1627_p12 = pneg %p1626_p4  ;;  %p1633_p8 = por %p1632_p5, %p1631_p11 }
  0x28   : > { %p1634_p9 = pnand %p1633_p8, %p1627_p12 }
  0x2a   : > { %1637 = shalt.err (!%p1634_p9)
}
  0x2b   : > { %1513 = dma.hbm_to_vmem [thread:$0]  (!%p1856_p13), %s1852_s29, 128, %s1860_s30, %s363_s20  }
  0x2c   : > { %p2129_p0 = scmp.lt.s32.totalorder %s1704_s24, 3  ;;  %p2130_p1 = scmp.ge.s32.totalorder %s1704_s24, 1 }
  0x2e   : > { %p379_p3 = pnand %p2130_p1, %p2129_p0 }
  0x2f   : > { %s1894_s18 = sand.u32 (!%p379_p3), 1, %s1696_s22  }
  0x30   : > { %382 = sbr.rel (%p379_p3) target bundleno = 2478 (0x9ae), region = 68  ;;  %s1357_s28 = sshll.u32 (!%p379_p3), %s1894_s18, 3 }
  0x31   : > { %s385_s26 = scalar_lea.sflag (!%p379_p3), [#allocation3], %s1894_s18  ;;  %s388_s27 = scalar_lea.vmem (!%p379_p3), [#allocation2], %s1357_s28 }
  0x37   : > { %1683 = dma.done.wait (%p1832_p6), %s385_s26, 128  }
  0x38   : > { %1685 = vsyncadd (%p1832_p6), %s385_s26, 4294967168  ;;  %vm433_vm0 = vcmask 261120   ;;  %v1904_v0 = vld [vmem:[%s388_s27] sm:$0xff]  ;;  %v1707_v8 = vmov 0.0   ;;  %vm1708_vm1 = vmmov 0   ;;  %s1709_s26 = smov 96  }
  0x39   : > { %v434_v1 = vsel %vm433_vm0, %v1904_v0, 0.0  ;;  %v1568_v7 = vld [vmem:[%s2107_s3] sm:$0xff]   ;;  %1422 = vmatprep.subr.bf16.mxu0 %v1707_v8  ;;  %1426 = vmatprep.mubr.msk.bf16.mxu0 %vm1708_vm1, %v1707_v8  ;;  %v1569_v9 = vld [vmem:[%s2107_s3 + $0x8] sm:$0xff]   ;;  %s1710_s27 = smov 120   ;;  %s1711_s30 = smov 88   ;;  %vm528_vm2 = vcmask 64512  }
  0x3a   : > { %435 = vadd.xlane.f32.xlu0 %v434_v1  ;;  %1423 = vmatpush3.bf16.msra.mxu0 %v1568_v7  ;;  %v1359_v14 = vld [vmem:[%s2105_s1] ss:$0 sm:$0xff]  ;;  %s1712_s29 = smov 80   ;;  %s1713_s14 = smov 112   ;;  %vm595_vm3 = vcmask 1043456   ;;  %vm1004_vm4 = vcmask 130048  }
  0x3b   : > { %1430 = vmatprep.subr.bf16.mxu1 %v1707_v8  ;;  %1424 = vmatprep.subr.bf16.mxu0 %v1707_v8  ;;  %v1360_v16 = vld [vmem:[%s2106_s2] ss:$0 sm:$0xff]  ;;  %s1714_s20 = smov 72   ;;  %s1715_s17 = smov 104   ;;  %vm1006_vm5 = vcmask 195584   ;;  %vm1221_vm6 = vcmask 523264  }
  0x3c   : > { %1432 = vmatprep.mubr.msk.bf16.mxu1 %vm1708_vm1, %v1707_v8  ;;  %s1716_s13 = smov 64   ;;  %s1717_s19 = smov 56  }
  0x3d   : > { %s1718_s23 = smov 48   ;;  %p2131_p11 = scmp.ne.s32.totalorder %s2126_s15, 0 }
  0x3e   : > { %1425 = vmatpush3.bf16.msra.mxu0 %v1569_v9 }
  0x3f   : > { %1436 = vmatprep.subr.bf16.mxu0 %v1707_v8 }
  0xc7   : > { %v436_v2 = vpop.xlane.xlu0 %435 }
  0xc8   : > { %v438_v3 = vmul.f32 0.03125, %v436_v2 }
  0xca   : > { %v439_v4 = vsub.f32 %v1904_v0, %v438_v3 }
  0xcc   : > { %v440_v5 = vmul.f32 %v439_v4, %v439_v4 }
  0xce   : > { %v441_v6 = vsel %vm433_vm0, %v440_v5, 0.0 }
  0xcf   : > { %442 = vadd.xlane.f32.xlu0 %v441_v6 }
 0x15c   : > { %v443_v10 = vpop.xlane.xlu0 %442 }
 0x15d   : > { %v444_v11 = vmul.f32 0.03125, %v443_v10 }
 0x15f   : > { %v445_v12 = vadd.f32 1e-05, %v444_v11 }
 0x161   : > { %1578 = vrsqrt.f32 %v445_v12 }
 0x16b   : > { %v1579_v13 = vpop.eup %1578 }
 0x16c   : > { %v447_v15 = vmul.f32 %v1579_v13, %v439_v4 }
 0x16e   : > { %v454_v17 = vmul.f32 %v1359_v14, %v447_v15 }
 0x170   : > { %v461_v18 = vadd.f32 %v1360_v16, %v454_v17 }
 0x172   : > { %v462_v19 = vpack.c.bf16 %v461_v18, %v461_v18 }
 0x174   : > { %1427 = vmatmul.mubr.msk.bf16.vlgmr.msra.gmra.mrb[0].mxu0 %vm433_vm0, %v462_v19 }
 0x175   : > { %1438 = vmatprep.mubr.msk.bf16.mxu0 %vm1708_vm1, %v1707_v8 }
 0x247   : > { %v516_v20 = vpop.f32.mrb[0].mxu0 }
 0x248   : > { %v522_v21 = vmul.f32 0.35355338, %v516_v20  ;;  %v1933_v22 = vpack.c.bf16 %v516_v20, %v516_v20  ;;  %v1428_v23 = vpop.f32.mrb[1].mxu0 }
 0x249   : > { %v519_v24 = vpop.f32.mrb[2].mxu0 }
 0x24a   : > { %v523_v25 = vpack.c.bf16 %v522_v21, %v522_v21  ;;  %526 = vrot.lane.b32.xlu1 %v1933_v22, %s1709_s26  ;;  %v1429_v26 = vpop.f32.mrb[3].mxu0  ;;  %s1719_s26 = smov 40  }
 0x24c   : > { %643 = vrot.lane.b32.xlu0 %v523_v25, %s1710_s27  ;;  %s1720_s27 = smov 8  }
 0x24e   : > { %645 = vrot.lane.b32.xlu1 %v1933_v22, %s1711_s30 }
 0x252   : > { %761 = vrot.lane.b32.xlu1 %v1933_v22, %s1712_s29 }
 0x256   : > { %759 = vrot.lane.b32.xlu1 %v523_v25, %s1713_s14 }
 0x25a   : > { %877 = vrot.lane.b32.xlu1 %v1933_v22, %s1714_s20 }
 0x25e   : > { %875 = vrot.lane.b32.xlu1 %v523_v25, %s1715_s17  ;;  %s1721_s17 = smov 16  }
 0x2bc   : > { %v527_v27 = vpop.permute.xlu1 %526 }
 0x2bd   : > { %v533_v28 = vsel %vm528_vm2, %v527_v27, 0 }
 0x2be   : > { %1431 = vmatpush3.bf16.xpose.msra.mxu1 %v533_v28  ;;  %v644_v32 = vpop.permute.xlu0 %643 }
 0x2bf   : > { %1442 = vmatprep.subr.bf16.mxu1 %v1707_v8 }
 0x2c0   : > { %v646_v29 = vpop.permute.xlu1 %645 }
 0x2c1   : > { %v651_v30 = vsel %vm528_vm2, %v646_v29, 0 }
 0x2c4   : > { %v762_v31 = vpop.permute.xlu1 %761 }
 0x2c5   : > { %1433 = vmatmul.mubr.msk.bf16.vlgmr.msra.gmra.mrb[0].mxu1 %vm528_vm2, %v523_v25  ;;  %v767_v34 = vsel %vm528_vm2, %v762_v31, 0 }
 0x2c6   : > { %1443 = vmatpush3.bf16.xpose.msra.mxu1 %v651_v30  ;;  %1444 = vmatprep.mubr.msk.bf16.mxu1 %vm1708_vm1, %v1707_v8 }
 0x2c7   : > { %1454 = vmatprep.subr.bf16.mxu1 %v1707_v8 }
 0x2c8   : > { %v760_v33 = vpop.permute.xlu1 %759 }
 0x2cc   : > { %v878_v35 = vpop.permute.xlu1 %877 }
 0x2cd   : > { %1445 = vmatmul.mubr.msk.bf16.vlgmr.msra.gmra.mrb[4].mxu1 %vm528_vm2, %v644_v32  ;;  %v883_v36 = vsel %vm528_vm2, %v878_v35, 0 }
 0x2ce   : > { %1455 = vmatpush3.bf16.xpose.msra.mxu1 %v767_v34  ;;  %1456 = vmatprep.mubr.msk.bf16.mxu1 %vm1708_vm1, %v1707_v8 }
 0x2cf   : > { %1466 = vmatprep.subr.bf16.mxu1 %v1707_v8 }
 0x2d0   : > { %v876_v37 = vpop.permute.xlu1 %875 }
 0x2d5   : > { %1457 = vmatmul.mubr.msk.bf16.vlgmr.msra.gmra.mrb[8].mxu1 %vm528_vm2, %v760_v33 }
 0x2d6   : > { %1467 = vmatpush3.bf16.xpose.msra.mxu1 %v883_v36  ;;  %1468 = vmatprep.mubr.msk.bf16.mxu1 %vm1708_vm1, %v1707_v8 }
 0x2d7   : > { %1478 = vmatprep.subr.bf16.mxu1 %v1707_v8 }
 0x2dd   : > { %1469 = vmatmul.mubr.msk.bf16.vlgmr.msra.gmra.mrb[12].mxu1 %vm528_vm2, %v876_v37 }
 0x2de   : > { %1482 = vmatprep.mubr.msk.bf16.mxu1 %vm1708_vm1, %v1707_v8 }
 0x398   : > { %v569_v38 = vpop.f32.mrb[0].mxu1 }
 0x399   : > { %v1434_v39 = vpop.f32.mrb[1].mxu1  ;;  %v575_v40 = vsel %vm528_vm2, %v569_v38, -inf }
 0x39a   : > { %576 = vmax.xlane.f32.xlu1 %v575_v40  ;;  %v572_v41 = vpop.f32.mrb[2].mxu1 }
 0x39b   : > { %v1435_v42 = vpop.f32.mrb[3].mxu1 }
 0x3a0   : > { %v687_v43 = vpop.f32.mrb[4].mxu1 }
 0x3a1   : > { %v1446_v44 = vpop.f32.mrb[5].mxu1  ;;  %v693_v45 = vsel %vm528_vm2, %v687_v43, -inf }
 0x3a2   : > { %694 = vmax.xlane.f32.xlu0 %v693_v45  ;;  %v690_v46 = vpop.f32.mrb[6].mxu1 }
 0x3a3   : > { %v1447_v47 = vpop.f32.mrb[7].mxu1 }
 0x3a8   : > { %v803_v48 = vpop.f32.mrb[8].mxu1 }
 0x3a9   : > { %v1458_v49 = vpop.f32.mrb[9].mxu1  ;;  %v809_v57 = vsel %vm528_vm2, %v803_v48, -inf }
 0x3aa   : > { %v806_v50 = vpop.f32.mrb[10].mxu1 }
 0x3ab   : > { %590 = vrot.lane.b32.xlu1 %v1933_v22, %s1716_s13  ;;  %v1459_v51 = vpop.f32.mrb[11].mxu1  ;;  %s1722_s13 = smov 24  }
 0x3b0   : > { %v919_v52 = vpop.f32.mrb[12].mxu1 }
 0x3b1   : > { %v1470_v53 = vpop.f32.mrb[13].mxu1  ;;  %v925_v54 = vsel %vm528_vm2, %v919_v52, -inf }
 0x3b2   : > { %926 = vmax.xlane.f32.xlu0 %v925_v54  ;;  %v922_v55 = vpop.f32.mrb[14].mxu1 }
 0x3b3   : > { %v1471_v56 = vpop.f32.mrb[15].mxu1 }
 0x3c8   : > { %708 = vrot.lane.b32.xlu0 %v1933_v22, %s1717_s19 }
 0x3cf   : > { %810 = vmax.xlane.f32.xlu1 %v809_v57 }
 0x3e0   : > { %824 = vrot.lane.b32.xlu1 %v1933_v22, %s1718_s23 }
 0x3e4   : > { %940 = vrot.lane.b32.xlu1 %v1933_v22, %s1719_s26  ;;  %s1389_s26 = sshll.u32 %s1810_s25, 7  ;;  %s1268_s25 = scalar_lea.sflag [#allocation4], %s1894_s18 }
 0x3e5   : > { %s2059_s20 = scalar_lea.hbm %s2116_s12, %s1389_s26 }
 0x427   : > { %v577_v58 = vpop.xlane.xlu1 %576 }
 0x428   : > { %v581_v59 = vsub.f32 %v569_v38, %v577_v58  ;;  %v578_v28 = vsub.f32 -inf, %v577_v58 }
 0x42a   : > { %v582_v60 = vmul.f32 1.442695, %v581_v59  ;;  %v579_v29 = vmul.f32 1.442695, %v578_v28 }
 0x42b   : > { %v591_v61 = vpop.permute.xlu1 %590 }
 0x42c   : > { %v597_v62 = vsel %vm595_vm3, %v591_v61, 0  ;;  %1580 = vpow2.f32 %v582_v60 }
 0x42d   : > { %1437 = vmatpush3.bf16.msra.mxu0 %v597_v62 }
 0x42e   : > { %1448 = vmatprep.subr.bf16.mxu0 %v1707_v8 }
 0x42f   : > { %v695_v63 = vpop.xlane.xlu0 %694 }
 0x430   : > { %v699_v1 = vsub.f32 %v687_v43, %v695_v63  ;;  %v696_v31 = vsub.f32 -inf, %v695_v63 }
 0x432   : > { %v700_v2 = vmul.f32 1.442695, %v699_v1  ;;  %v697_v34 = vmul.f32 1.442695, %v696_v31  ;;  %v1570_v1 = vld [vmem:[%s2108_s4] sm:$0xff]  }
 0x433   : > { %1479 = vmatpush3.bf16.msra.mxu1 %v1570_v1 }
 0x434   : > { %1582 = vpow2.f32 %v700_v2  ;;  %1480 = vmatprep.subr.bf16.mxu1 %v1707_v8 }
 0x436   : > { %v1581_v3 = vpop.eup %1580 }
 0x437   : > { %v589_v4 = vpack.c.bf16 %v1581_v3, %v1581_v3  ;;  %v585_v16 = vsel %vm528_vm2, %v1581_v3, 0.0  ;;  %v1571_v3 = vld [vmem:[%s2108_s4 + $0x8] sm:$0xff]  }
 0x438   : > { %1481 = vmatpush3.bf16.msra.mxu1 %v1571_v3 }
 0x439   : > { %1439 = vmatmul.mubr.msk.bf16.vlgmr.msra.gmra.mrb[4].mxu0 %vm528_vm2, %v589_v4  ;;  %1494 = vmatprep.subr.bf16.mxu1 %v1707_v8 }
 0x43a   : > { %1450 = vmatprep.mubr.msk.bf16.mxu0 %vm1708_vm1, %v1707_v8 }
 0x43e   : > { %v1583_v5 = vpop.eup %1582 }
 0x43f   : > { %v1972_v6 = vpop.xlane.xlu0 %926  ;;  %v703_v9 = vsel %vm528_vm2, %v1583_v5, 0.0  ;;  %v707_v13 = vpack.c.bf16 %v1583_v5, %v1583_v5 }
 0x440   : > { %v931_v7 = vsub.f32 %v919_v52, %v1972_v6  ;;  %704 = vadd.xlane.f32.xlu0 %v703_v9  ;;  %v928_v57 = vsub.f32 -inf, %v1972_v6 }
 0x442   : > { %v932_v10 = vmul.f32 1.442695, %v931_v7  ;;  %v929_v58 = vmul.f32 1.442695, %v928_v57 }
 0x443   : > { %v709_v11 = vpop.permute.xlu0 %708 }
 0x444   : > { %v714_v12 = vsel %vm595_vm3, %v709_v11, 0  ;;  %1584 = vpow2.f32 %v932_v10 }
 0x445   : > { %1449 = vmatpush3.bf16.msra.mxu0 %v714_v12 }
 0x446   : > { %1460 = vmatprep.subr.bf16.mxu0 %v1707_v8 }
 0x448   : > { %1451 = vmatmul.mubr.msk.bf16.vlgmr.msra.gmra.mrb[8].mxu0 %vm528_vm2, %v707_v13 }
 0x449   : > { %1462 = vmatprep.mubr.msk.bf16.mxu0 %vm1708_vm1, %v1707_v8 }
 0x44e   : > { %v1585_v14 = vpop.eup %1584 }
 0x44f   : > { %v935_v15 = vsel %vm528_vm2, %v1585_v14, 0.0  ;;  %v939_v27 = vpack.c.bf16 %v1585_v14, %v1585_v14 }
 0x450   : > { %936 = vadd.xlane.f32.xlu0 %v935_v15 }
 0x454   : > { %586 = vadd.xlane.f32.xlu0 %v585_v16 }
 0x45c   : > { %v811_v17 = vpop.xlane.xlu1 %810 }
 0x45d   : > { %v815_v18 = vsub.f32 %v803_v48, %v811_v17  ;;  %v812_v55 = vsub.f32 -inf, %v811_v17 }
 0x45f   : > { %v816_v19 = vmul.f32 1.442695, %v815_v18  ;;  %v813_v56 = vmul.f32 1.442695, %v812_v55  ;;  %v1378_v55 = vld [vmem:[%s2113_s9] ss:$0 sm:$0xff] }
 0x460   : > { %v825_v20 = vpop.permute.xlu1 %824 }
 0x461   : > { %v830_v21 = vsel %vm595_vm3, %v825_v20, 0  ;;  %1586 = vpow2.f32 %v816_v19 }
 0x462   : > { %1461 = vmatpush3.bf16.msra.mxu0 %v830_v21  ;;  %1588 = vpow2.f32 %v579_v29 }
 0x463   : > { %1472 = vmatprep.subr.bf16.mxu0 %v1707_v8  ;;  %1590 = vpow2.f32 %v697_v34 }
 0x464   : > { %v941_v23 = vpop.permute.xlu1 %940 }
 0x465   : > { %v946_v26 = vsel %vm595_vm3, %v941_v23, 0 }
 0x46b   : > { %v1587_v22 = vpop.eup %1586 }
 0x46c   : > { %v819_v24 = vsel %vm528_vm2, %v1587_v22, 0.0  ;;  %v823_v25 = vpack.c.bf16 %v1587_v22, %v1587_v22  ;;  %v1589_v33 = vpop.eup %1588 }
 0x46d   : > { %820 = vadd.xlane.f32.xlu1 %v819_v24  ;;  %v584_v36 = vmul.f32 0.0, %v1589_v33  ;;  %v1591_v38 = vpop.eup %1590 }
 0x46e   : > { %1463 = vmatmul.mubr.msk.bf16.vlgmr.msra.gmra.mrb[12].mxu0 %vm528_vm2, %v823_v25  ;;  %v702_v39 = vmul.f32 0.0, %v1591_v38 }
 0x46f   : > { %1473 = vmatpush3.bf16.msra.mxu0 %v946_v26  ;;  %1474 = vmatprep.mubr.msk.bf16.mxu0 %vm1708_vm1, %v1707_v8 }
 0x470   : > { %1486 = vmatprep.subr.bf16.mxu0 %v1707_v8 }
 0x476   : > { %1475 = vmatmul.mubr.msk.bf16.vlgmr.msra.gmra.mrb[16].mxu0 %vm528_vm2, %v939_v27  ;;  %v1372_v27 = vld [vmem:[%s2109_s5] ss:$0 sm:$0xff] }
 0x477   : > { %1490 = vmatprep.mubr.msk.bf16.mxu0 %vm1708_vm1, %v1707_v8 }
 0x4cd   : > { %v705_v30 = vpop.xlane.xlu0 %704 }
 0x4ce   : > { %v706_v44 = vadd.f32 %v705_v30, %v702_v39 }
 0x4dd   : > { %v937_v32 = vpop.xlane.xlu0 %936 }
 0x4e1   : > { %v587_v35 = vpop.xlane.xlu0 %586 }
 0x4e2   : > { %v588_v37 = vadd.f32 %v587_v35, %v584_v36 }
 0x4e4   : > { %1592 = vrcp.f32 %v588_v37 }
 0x4e5   : > { %1594 = vrcp.f32 %v706_v44 }
 0x4e6   : > { %1596 = vpow2.f32 %v813_v56 }
 0x4e7   : > { %1598 = vpow2.f32 %v929_v58 }
 0x4ee   : > { %v1593_v43 = vpop.eup %1592 }
 0x4ef   : > { %v1595_v51 = vpop.eup %1594 }
 0x4f0   : > { %v1597_v59 = vpop.eup %1596 }
 0x4f1   : > { %v818_v61 = vmul.f32 0.0, %v1597_v59  ;;  %v1599_v63 = vpop.eup %1598 }
 0x4f2   : > { %v934_v2 = vmul.f32 0.0, %v1599_v63 }
 0x4f4   : > { %v938_v4 = vadd.f32 %v937_v32, %v934_v2 }
 0x4fa   : > { %v821_v60 = vpop.xlane.xlu1 %820 }
 0x4fb   : > { %v822_v62 = vadd.f32 %v821_v60, %v818_v61 }
 0x4fd   : > { %1600 = vrcp.f32 %v822_v62 }
 0x4fe   : > { %1602 = vrcp.f32 %v938_v4 }
 0x507   : > { %v1601_v9 = vpop.eup %1600 }
 0x508   : > { %v1603_v16 = vpop.eup %1602 }
 0x50c   : > { %v633_v40 = vpop.f32.mrb[4].mxu0 }
 0x50d   : > { %v639_v41 = vadd.f32 %v633_v40, %v584_v36  ;;  %v1440_v42 = vpop.f32.mrb[5].mxu0  ;;  %v1572_v40 = vld [vmem:[%s2112_s8] sm:$0xff]  }
 0x50e   : > { %v636_v45 = vpop.f32.mrb[6].mxu0  ;;  %1487 = vmatpush3.bf16.msra.mxu0 %v1572_v40 }
 0x50f   : > { %v641_v46 = vmul.f32 %v1593_v43, %v639_v41  ;;  %v1441_v47 = vpop.f32.mrb[7].mxu0  ;;  %1488 = vmatprep.subr.bf16.mxu0 %v1707_v8  ;;  %v1376_v45 = vld [vmem:[%s2110_s6] ss:$0 sm:$0xff] }
 0x510   : > { %v1377_v47 = vld [vmem:[%s2111_s7] ss:$0 sm:$0xff] }
 0x51b   : > { %v750_v48 = vpop.f32.mrb[8].mxu0 }
 0x51c   : > { %v756_v49 = vadd.f32 %v750_v48, %v702_v39  ;;  %v1452_v50 = vpop.f32.mrb[9].mxu0 }
 0x51d   : > { %v753_v52 = vpop.f32.mrb[10].mxu0 }
 0x51e   : > { %v758_v53 = vmul.f32 %v1595_v51, %v756_v49  ;;  %v1453_v54 = vpop.f32.mrb[11].mxu0  ;;  %v1574_v51 = vld [vmem:[%s2114_s10] sm:$0xff]   ;;  %v1575_v52 = vld [vmem:[%s2114_s10 + $0x8] sm:$0xff]  }
 0x51f   : > { %v1577_v54 = vld [vmem:[%s2114_s10 + $0x18] sm:$0xff]  }
 0x520   : > { %992 = vrot.lane.b32.xlu1 %v758_v53, %s1720_s27  ;;  %v1576_v53 = vld [vmem:[%s2114_s10 + $0x10] sm:$0xff]   ;;  %s428_s27 = scalar_lea.vmem [#allocation5], %s1357_s28 }
 0x521   : > { %s1281_s30 = sshll.u32 %s428_s27, 4  ;;  %s2061_s30 = int_to_ptr.vmem [resolvable:$true] %s1281_s30 }
 0x522   : > { %s1638_s28 = scalar_lea.vmem %s2061_s30, 128 }
 0x523   : > { %p1639_p6 = scmp.ne.s32.totalorder %s2061_s30, %s1638_s28 }
 0x525   : > { %p1640_p12 = pnand %p1639_p6, %p2131_p11 }
 0x527   : > { %p1641_p13 = pneg %p1640_p12 }
 0x541   : > { %v866_v5 = vpop.f32.mrb[12].mxu0 }
 0x542   : > { %v872_v6 = vadd.f32 %v866_v5, %v818_v61  ;;  %v1464_v7 = vpop.f32.mrb[13].mxu0 }
 0x543   : > { %v869_v10 = vpop.f32.mrb[14].mxu0  ;;  %v1382_v7 = vld [vmem:[%s2115_s11] ss:$0 sm:$0xff] }
 0x544   : > { %v874_v11 = vmul.f32 %v1601_v9, %v872_v6  ;;  %v1465_v12 = vpop.f32.mrb[15].mxu0 }
 0x546   : > { %996 = vrot.lane.b32.xlu0 %v874_v11, %s1721_s17  ;;  %s1723_s17 = smov [#allocation5]  }
 0x549   : > { %v982_v13 = vpop.f32.mrb[16].mxu0 }
 0x54a   : > { %v988_v14 = vadd.f32 %v982_v13, %v934_v2  ;;  %v1476_v15 = vpop.f32.mrb[17].mxu0 }
 0x54b   : > { %v985_v17 = vpop.f32.mrb[18].mxu0 }
 0x54c   : > { %v990_v18 = vmul.f32 %v1603_v16, %v988_v14  ;;  %v1477_v19 = vpop.f32.mrb[19].mxu0 }
 0x54e   : > { %1000 = vrot.lane.b32.xlu1 %v990_v18, %s1722_s13  ;;  %s1642_s13 = sshll.u32 %s1723_s17, 4  ;;  %s1643_s13 = int_to_ptr.vmem [resolvable:$false] %s1642_s13 }
 0x54f   : > { %s1644_s19 = scalar_lea.vmem %s1643_s13, 256  ;;  %p1645_p7 = scmp.lt.s32.totalorder %s2061_s30, %s1643_s13 }
 0x550   : > { %p1646_p10 = scmp.lt.s32.totalorder %s1644_s19, %s1638_s28 }
 0x552   : > { %p1647_p2 = por %p1646_p10, %p1645_p7 }
 0x554   : > { %p1648_p4 = pnand %p1647_p2, %p1641_p13 }
 0x592   : > { %v993_v20 = vpop.permute.xlu1 %992 }
 0x593   : > { %v1003_v22 = vsel %vm528_vm2, %v641_v46, %v993_v20 }
 0x5b8   : > { %v997_v21 = vpop.permute.xlu0 %996 }
 0x5b9   : > { %v1005_v23 = vsel %vm1004_vm4, %v1003_v22, %v997_v21 }
 0x5c0   : > { %v1001_v24 = vpop.permute.xlu1 %1000 }
 0x5c1   : > { %v1007_v25 = vsel %vm1006_vm5, %v1005_v23, %v1001_v24 }
 0x5c2   : > { %v1008_v26 = vpack.c.bf16 %v1007_v25, %v1007_v25 }
 0x5c4   : > { %1483 = vmatmul.mubr.msk.bf16.vlgmr.msra.gmra.mrb[16].mxu1 %vm433_vm0, %v1008_v26 }
 0x5c5   : > { %1502 = vmatprep.mubr.msk.bf16.mxu1 %vm1708_vm1, %v1707_v8  ;;  %1495 = vmatpush3.bf16.msra.mxu1 %v1574_v51 }
 0x5c6   : > { %1496 = vmatprep.subr.bf16.mxu1 %v1707_v8 }
 0x5c9   : > { %1497 = vmatpush3.bf16.msra.mxu1 %v1575_v52 }
 0x5ca   : > { %1498 = vmatprep.subr.bf16.mxu1 %v1707_v8 }
 0x5cd   : > { %1499 = vmatpush3.bf16.msra.mxu1 %v1576_v53 }
 0x5ce   : > { %1500 = vmatprep.subr.bf16.mxu1 %v1707_v8 }
 0x5d1   : > { %1501 = vmatpush3.bf16.msra.mxu1 %v1577_v54 }
 0x697   : > { %v1069_v28 = vpop.f32.mrb[16].mxu1 }
 0x698   : > { %v1070_v29 = vadd.f32 %v1372_v27, %v1069_v28  ;;  %v1484_v30 = vpop.f32.mrb[17].mxu1 }
 0x699   : > { %v1072_v31 = vpop.f32.mrb[18].mxu1 }
 0x69a   : > { %v2011_v32 = vadd.f32 %v1070_v29, %v1904_v0  ;;  %v1485_v33 = vpop.f32.mrb[19].mxu1  ;;  %v1573_v0 = vld [vmem:[%s2112_s8 + $0x8] sm:$0xff]  }
 0x69b   : > { %1489 = vmatpush3.bf16.msra.mxu0 %v1573_v0 }
 0x69c   : > { %v1078_v34 = vsel %vm433_vm0, %v2011_v32, 0.0 }
 0x69d   : > { %1079 = vadd.xlane.f32.xlu1 %v1078_v34 }
 0x72a   : > { %v1080_v35 = vpop.xlane.xlu1 %1079 }
 0x72b   : > { %v1081_v36 = vmul.f32 0.03125, %v1080_v35 }
 0x72d   : > { %v1082_v37 = vsub.f32 %v2011_v32, %v1081_v36 }
 0x72f   : > { %v1083_v38 = vmul.f32 %v1082_v37, %v1082_v37 }
 0x731   : > { %v1084_v39 = vsel %vm433_vm0, %v1083_v38, 0.0 }
 0x732   : > { %1085 = vadd.xlane.f32.xlu0 %v1084_v39 }
 0x7bf   : > { %v1086_v41 = vpop.xlane.xlu0 %1085 }
 0x7c0   : > { %v1087_v42 = vmul.f32 0.03125, %v1086_v41 }
 0x7c2   : > { %v1088_v43 = vadd.f32 1e-05, %v1087_v42 }
 0x7c4   : > { %1604 = vrsqrt.f32 %v1088_v43 }
 0x7ce   : > { %v1605_v44 = vpop.eup %1604 }
 0x7cf   : > { %v1090_v46 = vmul.f32 %v1605_v44, %v1082_v37 }
 0x7d1   : > { %v1097_v48 = vmul.f32 %v1376_v45, %v1090_v46 }
 0x7d3   : > { %v1104_v49 = vadd.f32 %v1377_v47, %v1097_v48 }
 0x7d5   : > { %v1105_v50 = vpack.c.bf16 %v1104_v49, %v1104_v49 }
 0x7d7   : > { %1491 = vmatmul.mubr.msk.bf16.vlgmr.msra.gmra.mrb[20].mxu0 %vm433_vm0, %v1105_v50 }
 0x8aa   : > { %v1166_v56 = vpop.f32.mrb[20].mxu0 }
 0x8ab   : > { %v1167_v57 = vadd.f32 %v1378_v55, %v1166_v56  ;;  %v1492_v58 = vpop.f32.mrb[21].mxu0 }
 0x8ac   : > { %v1169_v59 = vpop.f32.mrb[22].mxu0 }
 0x8ad   : > { %v1173_v60 = vmul.f32 0.044715, %v1167_v57  ;;  %v1493_v61 = vpop.f32.mrb[23].mxu0  ;;  %v1172_v8 = vmul.f32 0.5, %v1167_v57 }
 0x8af   : > { %v1174_v62 = vmul.f32 %v1173_v60, %v1167_v57 }
 0x8b1   : > { %v1175_v63 = vmul.f32 %v1174_v62, %v1167_v57 }
 0x8b3   : > { %v1176_v1 = vadd.f32 %v1175_v63, %v1167_v57 }
 0x8b5   : > { %v1177_v2 = vmul.f32 0.7978846, %v1176_v1 }
 0x8b7   : > { %1606 = vtanh.f32 %v1177_v2 }
 0x8c1   : > { %v1607_v3 = vpop.eup %1606 }
 0x8c2   : > { %v1179_v4 = vadd.f32 1.0, %v1607_v3 }
 0x8c4   : > { %v1180_v5 = vmul.f32 %v1179_v4, %v1172_v8 }
 0x8c6   : > { %v1181_v6 = vpack.c.bf16 %v1180_v5, %v1180_v5 }
 0x8c8   : > { %1503 = vmatmul.mubr.msk.bf16.vlgmr.msra.gmra.mrb[20].mxu1 %vm1221_vm6, %v1181_v6 }
 0x99b   : > { %v1259_v9 = vpop.f32.mrb[20].mxu1 }
 0x99c   : > { %v1260_v10 = vadd.f32 %v1382_v7, %v1259_v9  ;;  %v1504_v11 = vpop.f32.mrb[21].mxu1 }
 0x99d   : > { %v1262_v12 = vpop.f32.mrb[22].mxu1 }
 0x99e   : > { %v1265_v13 = vadd.f32 %v1260_v10, %v2011_v32  ;;  %v1505_v14 = vpop.f32.mrb[23].mxu1 }
 0x9a0   : > { %1266 = vst.msk [vmem:[%s428_s27] sm:$0xff] %vm433_vm0, %v1265_v13 }
 0x9a1   : > { %1651 = shalt.err (!%p1648_p4)
}
 0x9a2   : > { %s1652_s18 = scalar_lea.hbm %s2059_s20, 128  ;;  %s1656_s27 = scalar_lea.hbm %s2116_s12, 256 }
 0x9a3   : > { %p1653_p5 = scmp.ne.s32.totalorder %s2059_s20, %s1652_s18  ;;  %p1657_p0 = scmp.lt.u32.totalorder %s2059_s20, %s2116_s12 }
 0x9a4   : > { %p1658_p1 = scmp.lt.u32.totalorder %s1656_s27, %s1652_s18  ;;  %p1660_p6 = scmp.lt.u32.totalorder %s1652_s18, %s2059_s20 }
 0x9a5   : > { %p1654_p8 = pnand %p1653_p5, %p2131_p11 }
 0x9a6   : > { %p1659_p3 = por %p1658_p1, %p1657_p0 }
 0x9a7   : > { %p1655_p9 = pneg %p1654_p8 }
 0x9a8   : > { %p1661_p12 = por %p1660_p6, %p1659_p3 }
 0x9aa   : > { %p1662_p13 = pnand %p1661_p12, %p1655_p9 }
 0x9ac   : > { %1665 = shalt.err (!%p1662_p13)
}
 0x9ad   : > { %1508 = dma.vmem_to_hbm [thread:$0]  (%p2131_p11), %s2061_s30, 128, %s2059_s20, %s1268_s25  }
 0x9ae PF: > { %s1293_s28 = sand.u32 1, %s1692_s21   ;;  %p2132_p7 = scmp.ne.s32.totalorder %s2127_s16, 0 }
 0x9af   : > { %p2133_p10 = scmp.ge.s32.totalorder %s1704_s24, 2  ;;  %s1294_s17 = scalar_lea.sflag [#allocation4], %s1293_s28 }
 0x9b1   : > { %p1515_p2 = pnand %p2133_p10, %p2132_p7 }
 0x9b3   : > { %1687 = dma.done.wait (!%p1515_p2), %s1294_s17, 128  }
 0x9b4   : > { %1689 = vsyncadd (!%p1515_p2), %s1294_s17, 4294967168  ;;  %s2134_s24 = sld [smem:[#allocation9_spill]]  ;;  %s2135_s13 = sld [smem:[#allocation8_spill]] }
 0x9b5   : > { %s2136_s23 = sld [smem:[#allocation10_spill]]  ;;  %s2137_s21 = smov %s1696_s22 }
 0x9ba   : > { %p25_p4 = scmp.ge.s32.totalorder %s2134_s24, 4   ;;  %s2138_s22 = smov %s2135_s13 }
 0x9bc   :  { %27 = sbr.rel (!%p25_p4) target bundleno = 5 (0x5), region = 113 }
 0x9c3   :  { %1299 = vsyncpa [#allocation3], 1 }
 0x9c4   :  { %1301 = vsyncpa [#allocation3 + $0x1], 1 }
 0x9c5   :  { %1302 = vsyncpa [#allocation4], 1 }
 0x9c6   :  { %1304 = vsyncpa [#allocation4 + $0x1], 1 }

</bundles_post_ra>
